<compile_context>
chip_gen: v5e
topology: v5e:2x2
jax: 0.10.0
libtpu: 0.0.40
codegen_flags: <defaults>
</compile_context>

<pallas_src>
import functools

import jax
import jax.numpy as jnp
from jax.experimental import pallas as pl
from jax.experimental.pallas import tpu as pltpu


# ----------------------------------------------------------------------------
# Kernel
# ----------------------------------------------------------------------------
def moe_grouped_kernel(tile_e_ref,       # SMEM (n_tiles,) int32  expert id per token tile
                       tile_valid_ref,   # SMEM (n_tiles,) int32  1 if tile holds routed tokens
                       x_ref,            # VMEM (tT, D)    gathered tokens (sorted by expert)
                       g_ref,            # VMEM (tT, 1)    f32 gating weight per sorted row
                       w13_ref,          # VMEM (D, 2*tH)  [w1 block | w3 block] for this expert
                       w2_ref,           # VMEM (tH, D)    down-proj block for this expert
                       o_ref,            # VMEM (tT, D)    output block (resident over h)
                       acc_ref):         # VMEM (tT, D)    fp32 accumulator scratch
    t = pl.program_id(0)
    h = pl.program_id(1)
    n_h = pl.num_programs(1)
    tH = w2_ref.shape[0]

    # Zero the fp32 accumulator at the start of every token tile's h sweep.
    @pl.when(h == 0)
    def _init():
        acc_ref[...] = jnp.zeros_like(acc_ref)

    # Only tiles that actually contain routed tokens do MXU/VPU work.
    @pl.when(tile_valid_ref[t] > 0)
    def _compute():
        x = x_ref[...]                                                    # (tT, D)
        # Fused gate/up projection: one matmul against [w1_blk | w3_blk].
        h13 = jnp.dot(x, w13_ref[...], preferred_element_type=jnp.float32)  # (tT, 2tH)
        h1 = h13[:, :tH]
        h3 = h13[:, tH:]
        act = (h1 * jax.nn.sigmoid(h1)) * h3                              # SwiGLU, f32
        # Apply the gating weight at (tT, tH) (cheaper than at (tT, D)) and
        # cast explicitly to the weight dtype so the second dot stays on the
        # fast MXU path when weights are bf16.
        act = (g_ref[...] * act).astype(w2_ref.dtype)
        acc_ref[...] += jnp.dot(act, w2_ref[...],
                                preferred_element_type=jnp.float32)       # (tT, D)

    # Single lane-dense writeback + cast at the end of the h reduction.
    @pl.when(h == n_h - 1)
    def _finalize():
        o_ref[...] = acc_ref[...].astype(o_ref.dtype)


# ----------------------------------------------------------------------------
# Parameter prep (call ONCE, outside the per-token forward)
# ----------------------------------------------------------------------------
def prepare_moe_params(w1, w3, w2, *, tH, weight_dtype=None):
    """Pre-transpose / fuse expert weights for the kernel.

    Returns (w13, w2t):
      w13 : (E, D, 2H)  where columns [h*2tH : h*2tH+tH] are w1's h-th tH block
            and [h*2tH+tH : (h+1)*2tH] are w3's h-th tH block.
      w2t : (E, H, D)
    """
    E, H, D = w1.shape
    assert H % tH == 0, "H must be divisible by tH"
    w1t = jnp.swapaxes(w1, 1, 2)                      # (E, D, H)
    w3t = jnp.swapaxes(w3, 1, 2)                      # (E, D, H)
    w13 = jnp.concatenate(
        [w1t.reshape(E, D, H // tH, tH), w3t.reshape(E, D, H // tH, tH)],
        axis=-1).reshape(E, D, 2 * H)                 # interleaved per tH block
    w2t = jnp.swapaxes(w2, 1, 2)                      # (E, H, D)
    if weight_dtype is not None:
        w13 = w13.astype(weight_dtype)
        w2t = w2t.astype(weight_dtype)
    return w13, w2t


# ----------------------------------------------------------------------------
# Router + megablocks-style grouping (JAX glue)
# ----------------------------------------------------------------------------
def _round_up(a, b):
    return ((a + b - 1) // b) * b


def _route_and_group(x, gate_w, num_experts, k, tT):
    """Top-k router, then sort (token, expert) assignments by expert and pad
    each expert group to a multiple of tT.  Returns per-row and per-tile
    metadata for the grouped kernel."""
    T = x.shape[0]
    E = num_experts

    logits = jnp.dot(x, gate_w.T, preferred_element_type=jnp.float32)   # (T, E) f32
    topk_vals, topk_idx = jax.lax.top_k(logits, k)                      # (T, k)
    gates = jax.nn.softmax(topk_vals, axis=-1)                          # f32 (kept f32)

    flat_e = topk_idx.reshape(-1).astype(jnp.int32)                     # (T*k,)
    flat_t = jnp.repeat(jnp.arange(T, dtype=jnp.int32), k)              # (T*k,)
    flat_g = gates.reshape(-1)                                          # (T*k,) f32

    counts = jnp.zeros((E,), jnp.int32).at[flat_e].add(1)               # tokens/expert
    padded = ((counts + tT - 1) // tT) * tT                             # group size rounded to tT
    group_end = jnp.cumsum(padded)
    group_start = group_end - padded
    csum_excl = jnp.cumsum(counts) - counts                             # exclusive cumsum

    order = jnp.argsort(flat_e)                                         # sort by expert
    sorted_e = flat_e[order]
    sorted_t = flat_t[order]
    sorted_g = flat_g[order]
    within = jnp.arange(T * k, dtype=jnp.int32) - csum_excl[sorted_e]
    dest = group_start[sorted_e] + within                               # unique slots

    S = _round_up(T * k, tT) + E * tT                                   # static capacity
    token_ids = jnp.zeros((S,), jnp.int32).at[dest].set(sorted_t)
    gates_p = jnp.zeros((S,), jnp.float32).at[dest].set(sorted_g)       # 0 on pad rows

    n_tiles = S // tT
    tile_start = jnp.arange(n_tiles, dtype=jnp.int32) * tT
    total_padded = group_end[-1]
    tile_e_raw = jnp.searchsorted(group_end, tile_start, side="right").astype(jnp.int32)
    tile_valid = (tile_start < total_padded).astype(jnp.int32)
    tile_e = jnp.minimum(tile_e_raw, E - 1)
    # Invalid (pure padding) tiles reuse the expert of the last valid tile so
    # their weight index_map can be pinned to the previous block (DMA elided).
    num_valid = jnp.maximum(total_padded // tT, 1)
    last_e = tile_e[num_valid - 1]
    tile_e = jnp.where(tile_valid == 1, tile_e, last_e).astype(jnp.int32)

    return token_ids, gates_p, tile_e, tile_valid, S, n_tiles


def _default_vmem_limit():
    try:
        cap = getattr(pltpu.get_tpu_info(), "vmem_capacity_bytes", None)
        if cap:
            return int(cap) * 3 // 4
    except Exception:
        pass
    return 48 * 1024 * 1024   # safe on every generation (<= v7x's 64 MiB/TC)


# ----------------------------------------------------------------------------
# Forward
# ----------------------------------------------------------------------------
def moe_forward(x, gate_w, w13, w2t, *, num_experts_per_tok,
                tT=256, tH=None, vmem_limit_bytes=None):
    """x: (T, D); gate_w: (E, D); (w13, w2t) from prepare_moe_params(tH=tH)."""
    T, D = x.shape
    E, H, _ = w2t.shape
    k = num_experts_per_tok
    if tH is None:
        tH = min(H, 512)
    assert w13.shape == (E, D, 2 * H), "w13 must come from prepare_moe_params"
    assert H % tH == 0 and tT % 8 == 0
    assert tH == H or (2 * tH) % 128 == 0, "tH must be a multiple of 64 (or == H)"
    if vmem_limit_bytes is None:
        vmem_limit_bytes = _default_vmem_limit()

    # --- router + token grouping (data-dependent: plain JAX glue) -----------
    token_ids, gates_p, tile_e, tile_valid, S, n_tiles = _route_and_group(
        x, gate_w, E, k, tT)

    # Gather tokens into expert-grouped order; cast once to the weight dtype so
    # the kernel's MXU dots run in the weight precision (bf16 fast path).
    x_sorted = jnp.take(x, token_ids, axis=0).astype(w13.dtype)          # (S, D)
    gates_2d = gates_p.reshape(S, 1)                                     # (S, 1) f32

    n_h = H // tH
    grid = (n_tiles, n_h)     # (token-group tiles: parallel, H tiles: reduction)

    def x_map(t, h, te, tv):
        return (t, 0)

    def g_map(t, h, te, tv):
        return (t, 0)

    def w13_map(t, h, te, tv):
        v = tv[t]
        hh = h * v + (1 - v) * (n_h - 1)      # pin h for padding tiles -> DMA elided
        return (te[t], 0, hh)

    def w2_map(t, h, te, tv):
        v = tv[t]
        hh = h * v + (1 - v) * (n_h - 1)
        return (te[t], hh, 0)

    itemsize = lambda a: jnp.dtype(a.dtype).itemsize
    cost = pl.CostEstimate(
        flops=int(6 * T * k * D * H),
        transcendentals=int(T * k * H),
        bytes_accessed=int(w13.size * itemsize(w13) + w2t.size * itemsize(w2t)
                           + 2 * S * D * itemsize(x_sorted)),
    )

    y_sorted = pl.pallas_call(
        moe_grouped_kernel,
        out_shape=jax.ShapeDtypeStruct((S, D), x.dtype),
        grid_spec=pltpu.PrefetchScalarGridSpec(
            num_scalar_prefetch=2,                                   # tile_e, tile_valid -> SMEM
            grid=grid,
            in_specs=[
                pl.BlockSpec((tT, D), x_map),                        # x_sorted
                pl.BlockSpec((tT, 1), g_map),                        # gating (f32)
                pl.BlockSpec((None, D, 2 * tH), w13_map),            # fused w1|w3 block
                pl.BlockSpec((None, tH, D), w2_map),                 # w2 block
            ],
            out_specs=pl.BlockSpec((tT, D), x_map),
            scratch_shapes=[pltpu.VMEM((tT, D), jnp.float32)],       # fp32 accumulator
        ),
        compiler_params=pltpu.CompilerParams(
            dimension_semantics=("parallel", "arbitrary"),
            vmem_limit_bytes=int(vmem_limit_bytes)),
        cost_estimate=cost,
    )(tile_e, tile_valid, x_sorted, gates_2d, w13, w2t)

    # Scatter-add expert outputs back to token order (f32 accumulation).
    out = jnp.zeros((T, D), jnp.float32).at[token_ids].add(
        y_sorted.astype(jnp.float32))
    return out.astype(x.dtype)


# ----------------------------------------------------------------------------
# Pure-JAX reference matching the PyTorch forward
# ----------------------------------------------------------------------------
def moe_reference(x, gate_w, w1, w3, w2, k):
    logits = x @ gate_w.T
    vals, idx = jax.lax.top_k(logits, k)
    wts = jax.nn.softmax(vals.astype(jnp.float32), axis=1).astype(x.dtype)
    out = jnp.zeros_like(x)
    for e in range(w1.shape[0]):
        w_e = jnp.sum(jnp.where(idx == e, wts, 0.0), axis=1, keepdims=True)
        h = jax.nn.silu(x @ w1[e].T) * (x @ w3[e].T)
        out = out + w_e * (h @ w2[e].T)
    return out


if __name__ == "__main__":
    # tokens, model dim, FFN hidden, num experts, top-k  (small, 128-aligned)
    T, D, H, E, K = 128, 128, 256, 4, 2
    tT, tH = 128, 128

    key = jax.random.PRNGKey(0)
    kx, kg, k1, k3, k2 = jax.random.split(key, 5)
    x = jax.random.normal(kx, (T, D), jnp.float32)
    gate_w = 0.1 * jax.random.normal(kg, (E, D), jnp.float32)
    w1 = 0.1 * jax.random.normal(k1, (E, H, D), jnp.float32)
    w3 = 0.1 * jax.random.normal(k3, (E, H, D), jnp.float32)
    w2 = 0.1 * jax.random.normal(k2, (E, D, H), jnp.float32)

    # Weight prep happens ONCE (hoisted out of the per-call forward).
    # For production use weight_dtype=jnp.bfloat16 to halve weight HBM traffic.
    w13, w2t = prepare_moe_params(w1, w3, w2, tH=tH, weight_dtype=None)

    fwd = jax.jit(functools.partial(moe_forward, num_experts_per_tok=K,
                                    tT=tT, tH=tH))
    out = fwd(x, gate_w, w13, w2t)
    out = jax.block_until_ready(out)

    ref = moe_reference(x, gate_w, w1, w3, w2, K)
    assert out.shape == x.shape and out.dtype == x.dtype
    assert jnp.allclose(out, ref, atol=2e-4, rtol=2e-4), "mismatch vs reference"

    print("KERNEL_OK")
</pallas_src>

<mosaic_0001>
module attributes {stable_mosaic.version = 11 : i64} {
  func.func @moe_grouped_kernel(%arg0: i32, %arg1: i32, %arg2: memref<6xi32, #tpu.memory_space<smem>>, %arg3: memref<6xi32, #tpu.memory_space<smem>>, %arg4: memref<128x128xf32, #tpu.memory_space<vmem>>, %arg5: memref<128x1xf32, #tpu.memory_space<vmem>>, %arg6: memref<1x128x256xf32, #tpu.memory_space<vmem>>, %arg7: memref<1x128x128xf32, #tpu.memory_space<vmem>>, %arg8: memref<128x128xf32, #tpu.memory_space<vmem>>, %arg9: memref<128x128xf32, #tpu.memory_space<vmem>>) attributes {dimension_semantics = [#tpu.dimension_semantics<parallel>, #tpu.dimension_semantics<arbitrary>], iteration_bounds = array<i64: 6, 2>, scalar_prefetch = 2 : i64, scratch_operands = 1 : i64, tpu.core_type = #tpu.core_type<tc>, window_params = [{transform_indices = @transform_0, window_bounds = array<i64: 128, 128>}, {transform_indices = @transform_1, window_bounds = array<i64: 128, 1>}, {transform_indices = @transform_2, window_bounds = array<i64: 1, 128, 256>}, {transform_indices = @transform_3, window_bounds = array<i64: 1, 128, 128>}, {transform_indices = @transform_4, window_bounds = array<i64: 128, 128>}]} {
    %c0_i32 = arith.constant 0 : i32
    %0 = arith.cmpi eq, %arg1, %c0_i32 : i32
    %1 = arith.extui %0 : i1 to i32
    %c0_i32_0 = arith.constant 0 : i32
    %2 = arith.cmpi ne, %1, %c0_i32_0 : i32
    scf.if %2 {
      %cst = arith.constant 0.000000e+00 : f32
      %11 = vector.broadcast %cst : f32 to vector<128x128xf32>
      %c0 = arith.constant 0 : index
      %c0_4 = arith.constant 0 : index
      %12 = vector.load %arg9[%c0, %c0_4] : memref<128x128xf32, #tpu.memory_space<vmem>>, vector<128x128xf32>
      tpu.vector_store %arg9[%c0, %c0_4], %11 {strides = array<i32>} : memref<128x128xf32, #tpu.memory_space<vmem>>, vector<128x128xf32>,
    } else {
    }
    %3 = arith.index_cast %arg0 : i32 to index
    %4 = memref.load %arg3[%3] : memref<6xi32, #tpu.memory_space<smem>>
    %c0_i32_1 = arith.constant 0 : i32
    %5 = arith.cmpi sgt, %4, %c0_i32_1 : i32
    %6 = arith.extui %5 : i1 to i32
    %c0_i32_2 = arith.constant 0 : i32
    %7 = arith.cmpi ne, %6, %c0_i32_2 : i32
    scf.if %7 {
      %c0 = arith.constant 0 : index
      %c0_4 = arith.constant 0 : index
      %11 = vector.load %arg4[%c0, %c0_4] : memref<128x128xf32, #tpu.memory_space<vmem>>, vector<128x128xf32>
      %c0_5 = arith.constant 0 : index
      %c0_6 = arith.constant 0 : index
      %c0_7 = arith.constant 0 : index
      %12 = vector.load %arg6[%c0_5, %c0_6, %c0_7] : memref<1x128x256xf32, #tpu.memory_space<vmem>>, vector<1x128x256xf32>
      %13 = vector.shape_cast %12 : vector<1x128x256xf32> to vector<128x256xf32>
      %cst = arith.constant dense<0.000000e+00> : vector<128x256xf32>
      %14 = tpu.matmul %11, %13, %cst {dimension_numbers = #tpu.dot_dimension_numbers<[1], [0], [0], [1], [0, 0, 1, 1], [], []>} : vector<128x128xf32>, vector<128x256xf32>, vector<128x256xf32> -> vector<128x256xf32>
      %15 = vector.extract_strided_slice %14 {offsets = [0, 0], sizes = [128, 128], strides = [1, 1]} : vector<128x256xf32> to vector<128x128xf32>
      %16 = vector.extract_strided_slice %14 {offsets = [0, 128], sizes = [128, 128], strides = [1, 1]} : vector<128x256xf32> to vector<128x128xf32>
      %17 = arith.negf %15 : vector<128x128xf32>
      %18 = math.exp %17 : vector<128x128xf32>
      %cst_8 = arith.constant 1.000000e+00 : f32
      %19 = vector.broadcast %cst_8 : f32 to vector<128x128xf32>
      %20 = arith.addf %19, %18 : vector<128x128xf32>
      %21 = arith.divf %19, %20 : vector<128x128xf32>
      %22 = arith.mulf %15, %21 : vector<128x128xf32>
      %23 = arith.mulf %22, %16 : vector<128x128xf32>
      %c0_9 = arith.constant 0 : index
      %c0_10 = arith.constant 0 : index
      %24 = vector.load %arg5[%c0_9, %c0_10] : memref<128x1xf32, #tpu.memory_space<vmem>>, vector<128x1xf32>
      %25 = vector.broadcast %24 : vector<128x1xf32> to vector<128x128xf32>
      %26 = arith.mulf %25, %23 : vector<128x128xf32>
      %c0_11 = arith.constant 0 : index
      %c0_12 = arith.constant 0 : index
      %27 = vector.load %arg9[%c0_11, %c0_12] : memref<128x128xf32, #tpu.memory_space<vmem>>, vector<128x128xf32>
      %c0_13 = arith.constant 0 : index
      %c0_14 = arith.constant 0 : index
      %c0_15 = arith.constant 0 : index
      %28 = vector.load %arg7[%c0_13, %c0_14, %c0_15] : memref<1x128x128xf32, #tpu.memory_space<vmem>>, vector<1x128x128xf32>
      %29 = vector.shape_cast %28 : vector<1x128x128xf32> to vector<128x128xf32>
      %cst_16 = arith.constant dense<0.000000e+00> : vector<128x128xf32>
      %30 = tpu.matmul %26, %29, %cst_16 {dimension_numbers = #tpu.dot_dimension_numbers<[1], [0], [0], [1], [0, 0, 1, 1], [], []>} : vector<128x128xf32>, vector<128x128xf32>, vector<128x128xf32> -> vector<128x128xf32>
      %31 = arith.addf %27, %30 : vector<128x128xf32>
      %c0_17 = arith.constant 0 : index
      %c0_18 = arith.constant 0 : index
      %32 = vector.load %arg9[%c0_17, %c0_18] : memref<128x128xf32, #tpu.memory_space<vmem>>, vector<128x128xf32>
      tpu.vector_store %arg9[%c0_17, %c0_18], %31 {strides = array<i32>} : memref<128x128xf32, #tpu.memory_space<vmem>>, vector<128x128xf32>,
    } else {
    }
    %c1_i32 = arith.constant 1 : i32
    %8 = arith.cmpi eq, %arg1, %c1_i32 : i32
    %9 = arith.extui %8 : i1 to i32
    %c0_i32_3 = arith.constant 0 : i32
    %10 = arith.cmpi ne, %9, %c0_i32_3 : i32
    scf.if %10 {
      %c0 = arith.constant 0 : index
      %c0_4 = arith.constant 0 : index
      %11 = vector.load %arg9[%c0, %c0_4] : memref<128x128xf32, #tpu.memory_space<vmem>>, vector<128x128xf32>
      %c0_5 = arith.constant 0 : index
      %c0_6 = arith.constant 0 : index
      %12 = vector.load %arg8[%c0_5, %c0_6] : memref<128x128xf32, #tpu.memory_space<vmem>>, vector<128x128xf32>
      tpu.vector_store %arg8[%c0_5, %c0_6], %11 {strides = array<i32>} : memref<128x128xf32, #tpu.memory_space<vmem>>, vector<128x128xf32>,
    } else {
    }
    return
  }
  func.func @transform_0(%arg0: i32, %arg1: i32, %arg2: memref<6xi32, #tpu.memory_space<smem>>, %arg3: memref<6xi32, #tpu.memory_space<smem>>) -> (i32, i32) {
    %c0_i32 = arith.constant 0 : i32
    %c0_i32_0 = arith.constant 0 : i32
    return %arg0, %c0_i32 : i32, i32
  }
  func.func @transform_1(%arg0: i32, %arg1: i32, %arg2: memref<6xi32, #tpu.memory_space<smem>>, %arg3: memref<6xi32, #tpu.memory_space<smem>>) -> (i32, i32) {
    %c0_i32 = arith.constant 0 : i32
    %c0_i32_0 = arith.constant 0 : i32
    return %arg0, %c0_i32 : i32, i32
  }
  func.func @transform_2(%arg0: i32, %arg1: i32, %arg2: memref<6xi32, #tpu.memory_space<smem>>, %arg3: memref<6xi32, #tpu.memory_space<smem>>) -> (i32, i32, i32) {
    %0 = arith.index_cast %arg0 : i32 to index
    %1 = memref.load %arg3[%0] : memref<6xi32, #tpu.memory_space<smem>>
    %2 = arith.muli %arg1, %1 : i32
    %c1_i32 = arith.constant 1 : i32
    %3 = arith.subi %c1_i32, %1 : i32
    %c1_i32_0 = arith.constant 1 : i32
    %4 = arith.muli %3, %c1_i32_0 : i32
    %5 = arith.addi %2, %4 : i32
    %6 = arith.index_cast %arg0 : i32 to index
    %7 = memref.load %arg2[%6] : memref<6xi32, #tpu.memory_space<smem>>
    %c0_i32 = arith.constant 0 : i32
    %c0_i32_1 = arith.constant 0 : i32
    return %7, %c0_i32, %5 : i32, i32, i32
  }
  func.func @transform_3(%arg0: i32, %arg1: i32, %arg2: memref<6xi32, #tpu.memory_space<smem>>, %arg3: memref<6xi32, #tpu.memory_space<smem>>) -> (i32, i32, i32) {
    %0 = arith.index_cast %arg0 : i32 to index
    %1 = memref.load %arg3[%0] : memref<6xi32, #tpu.memory_space<smem>>
    %2 = arith.muli %arg1, %1 : i32
    %c1_i32 = arith.constant 1 : i32
    %3 = arith.subi %c1_i32, %1 : i32
    %c1_i32_0 = arith.constant 1 : i32
    %4 = arith.muli %3, %c1_i32_0 : i32
    %5 = arith.addi %2, %4 : i32
    %6 = arith.index_cast %arg0 : i32 to index
    %7 = memref.load %arg2[%6] : memref<6xi32, #tpu.memory_space<smem>>
    %c0_i32 = arith.constant 0 : i32
    %c0_i32_1 = arith.constant 0 : i32
    return %7, %5, %c0_i32 : i32, i32, i32
  }
  func.func @transform_4(%arg0: i32, %arg1: i32, %arg2: memref<6xi32, #tpu.memory_space<smem>>, %arg3: memref<6xi32, #tpu.memory_space<smem>>) -> (i32, i32) {
    %c0_i32 = arith.constant 0 : i32
    %c0_i32_0 = arith.constant 0 : i32
    return %arg0, %c0_i32 : i32, i32
  }
}

</mosaic_0001>

<bundles_post_ra>
// kernel: custom-call.1
= control target key start
LH: loop header
LB: loop body
LE: loop exit
PB: predicated region body
PF: predicated region fallthrough
CT: control target
= control target key end

     0   :  { %s6_s0 = inlined_call_operand.vmem [shape: u32[6], index: 0, kind: output, shape index: {}]  }

// kernel: moe_forward.1
= control target key start
LH: loop header
LB: loop body
LE: loop exit
PB: predicated region body
PF: predicated region fallthrough
CT: control target
= control target key end

     0   :  { %s1681_s27 = smov [#allocation4]   ;;  %s1682_s28 = smov [#allocation5]   ;;  %s2311_s0 = inlined_call_operand.vmem [shape: s32[6], index: 0, kind: input, shape index: {}]   ;;  %s2312_s2 = inlined_call_operand.vmem [shape: f32[768,128], index: 2, kind: input, shape index: {}]   ;;  %s2313_s3 = inlined_call_operand.vmem [shape: f32[768,1], index: 3, kind: input, shape index: {}]   ;;  %s2314_s4 = inlined_call_operand.vmem [shape: f32[4,128,512], index: 4, kind: input, shape index: {}]   ;;  %s2315_s5 = inlined_call_operand.vmem [shape: f32[4,256,128], index: 5, kind: input, shape index: {}]   ;;  %s2316_s6 = inlined_call_operand.vmem [shape: f32[768,128], index: 6, kind: output, shape index: {}]   ;;  %s2317_s1 = inlined_call_operand.vmem [shape: s32[6], index: 1, kind: input, shape index: {}]  }
   0x1   :  { %2318 = sst [smem:[#allocation8_spill]] %s2312_s2  ;;  %s12_s23 = sshll.u32 %s2311_s0, 4  ;;  %s13_s23 = int_to_ptr.vmem [resolvable:$true] %s12_s23 }
   0x2   :  { %2319 = sst [smem:[#allocation9_spill]] %s2313_s3  ;;  %s17_s26 = sshll.u32 %s2317_s1, 4  ;;  %s18_s26 = int_to_ptr.vmem [resolvable:$true] %s17_s26 }
   0x3   :  { %2320 = sst [smem:[#allocation10_spill]] %s2314_s4 }
   0x4   :  { %15 = dma.vmem_to_smem %s13_s23, 16, %s1681_s27, [#allocation3] }
   0x5   :  { %20 = dma.vmem_to_smem %s18_s26, 16, %s1682_s28, [#allocation3] }
   0x6   :  { %1651 = dma.done.wait [#allocation3], 32 }
   0x7   :  { %1652 = vsyncadd [#allocation3], 4294967264 }
   0x8   :  { %23 = sfence }
   0x9   :  { %s1726_s29 = smov 0   ;;  %s1728_s30 = smov 0  }
   0xa   :  { %s1730_s7 = smov 0   ;;  %s1732_s0 = smov 0  }
   0xb   :  { %s1734_s8 = smov 0   ;;  %s1736_s1 = smov 0  }
   0xc   :  { %s1738_s9 = smov 0  }
   0xd LB: > { %s38_s10 = sadd.s32 1, %s1671_s8  ;;  %s41_s11 = sadd.s32 1, %s1675_s1  ;;  %s1679_s9 = sphi %s1738_s9, %s29_s9   ;;  %s1675_s1 = sphi %s1736_s1, %s2350_s1   ;;  %s1671_s8 = sphi %s1734_s8, %s2349_s8   ;;  %s1667_s0 = sphi %s1732_s0, %s2348_s0   ;;  %s1663_s7 = sphi %s1730_s7, %s2347_s7   ;;  %s1659_s30 = sphi %s1728_s30, %s2346_s30   ;;  %s1655_s29 = sphi %s1726_s29, %s2345_s29  }
   0xe   : > { %p39_p0 = scmp.ge.s32.totalorder %s38_s10, 2  ;;  %s97_s12 = sld [smem:[#allocation5 + %s1675_s1]] }
   0xf   : > { %p119_p1 = scmp.ne.s32.totalorder %s1659_s30, %s1655_s29  ;;  %p120_p2 = scmp.eq.s32.totalorder %s1679_s9, 0 }
  0x10   : > { %s2352_s11 = smov (!%p39_p0, %s41_s11), %s1675_s1  ;;  %s2354_s10 = smov (%p39_p0, %s38_s10), 0 }
  0x11   : > { %p43_p3 = scmp.ge.s32.totalorder %s2352_s11, 6  ;;  %s101_s13 = sld [smem:[#allocation4 + %s1675_s1]] }
  0x12   : > { %p1773_p4 = por %p120_p2, %p119_p1  ;;  %s112_s26 = sadd.s32 1, %s1659_s30 }
  0x13   : > { %s2356_s11 = smov (%p43_p3, %s2352_s11), 0  ;;  %p1387_p6 = scmp.ge.s32.totalorder %s1679_s9, 12 }
  0x14   : > { %s102_s15 = sld [smem:[#allocation5 + %s2356_s11]]  ;;  %s98_s16 = smul.u32 %s1671_s8, %s97_s12 }
  0x15   : > { %s106_s17 = sld [smem:[#allocation4 + %s2356_s11]]  ;;  %s99_s18 = ssub.s32 1, %s97_s12 }
  0x16   : > { %s100_s19 = sadd.s32 %s99_s18, %s98_s16 }
  0x1a   : > { %s103_s20 = smul.u32 %s102_s15, %s2354_s10  ;;  %s104_s21 = ssub.s32 1, %s102_s15 }
  0x1b   : > { %s107_s22 = ssub.s32 %s101_s13, %s106_s17 }
  0x1c   : > { %s105_s23 = sadd.s32 %s104_s21, %s103_s20 }
  0x1d   : > { %s108_s24 = ssub.s32 %s100_s19, %s105_s23  ;;  %209 = sbr.rel (%p1387_p6) target bundleno = 80 (0x50), region = 16 }
  0x1e   : > { %s109_s25 = sor.u32 %s108_s24, %s107_s22 }
  0x1f   : > { %p110_p5 = scmp.eq.s32.totalorder %s109_s25, 0 }
  0x21   : > { %s1783_s27 = scalar_select %p110_p5, %s1659_s30, %s112_s26  }
  0x22   : > { %230 = sbr.rel (!%p1773_p4) target bundleno = 80 (0x50), region = 28  ;;  %s235_s28 = sld [smem:[#allocation5 + %s1675_s1]] (%p1773_p4) }
  0x23   : > { %s239_s12 = sld [smem:[#allocation4 + %s1675_s1]] (%p1773_p4)  ;;  %s232_s13 = sand.u32 (%p1773_p4), 1, %s1659_s30  }
  0x24   : > { %s1388_s18 = sshll.u32 (%p1773_p4), %s232_s13, 8  ;;  %s2322_s4 = sld [smem:[#allocation10_spill]] (%p1773_p4) }
  0x25   : > { %s1800_s25 = scalar_lea.vmem (%p1773_p4), [#allocation6], %s1388_s18 }
  0x28   : > { %s236_s15 = smul.u32 %s1671_s8, %s235_s28  ;;  %s237_s16 = ssub.s32 1, %s235_s28 }
  0x29   : > { %s1390_s17 = sshll.u32 %s239_s12, 6 }
  0x2a   : > { %s238_s19 = sadd.s32 %s237_s16, %s236_s15 }
  0x2b   : > { %s1389_s20 = sshll.u32 %s238_s19, 1 }
  0x2c   : > { %s242_s21 = sadd.s32 %s1390_s17, %s1389_s20 }
  0x2d   : > { %s1391_s22 = sshll.u32 %s242_s21, 3 }
  0x2e   : > { %s1795_s14 = scalar_lea.vmem %s2322_s4, %s1391_s22 }
  0x2f   : > { %v257_v0 = vld [vmem:[%s1795_s14] sm:$0xff]  ;;  %v259_v1 = vld [vmem:[%s1795_s14 + $0x8] sm:$0xff] }
  0x30   : > { %v261_v2 = vld [vmem:[%s1795_s14 + $0x20] sm:$0xff]  ;;  %258 = vst [vmem:[%s1800_s25] sm:$0xff] %v257_v0  ;;  %v263_v3 = vld [vmem:[%s1795_s14 + $0x28] sm:$0xff] }
  0x31   : > { %260 = vst [vmem:[%s1800_s25 + $0x8] sm:$0xff] %v259_v1  ;;  %v265_v4 = vld [vmem:[%s1795_s14 + $0x40] sm:$0xff]  ;;  %v267_v5 = vld [vmem:[%s1795_s14 + $0x48] sm:$0xff] }
  0x32   : > { %262 = vst [vmem:[%s1800_s25 + $0x10] sm:$0xff] %v261_v2  ;;  %v269_v6 = vld [vmem:[%s1795_s14 + $0x60] sm:$0xff]  ;;  %v271_v7 = vld [vmem:[%s1795_s14 + $0x68] sm:$0xff] }
  0x33   : > { %264 = vst [vmem:[%s1800_s25 + $0x18] sm:$0xff] %v263_v3  ;;  %v273_v8 = vld [vmem:[%s1795_s14 + $0x80] sm:$0xff]  ;;  %v275_v9 = vld [vmem:[%s1795_s14 + $0x88] sm:$0xff] }
  0x34   : > { %266 = vst [vmem:[%s1800_s25 + $0x20] sm:$0xff] %v265_v4  ;;  %v277_v10 = vld [vmem:[%s1795_s14 + $0xa0] sm:$0xff]  ;;  %v279_v11 = vld [vmem:[%s1795_s14 + $0xa8] sm:$0xff] }
  0x35   : > { %268 = vst [vmem:[%s1800_s25 + $0x28] sm:$0xff] %v267_v5  ;;  %v281_v12 = vld [vmem:[%s1795_s14 + $0xc0] sm:$0xff]  ;;  %v283_v13 = vld [vmem:[%s1795_s14 + $0xc8] sm:$0xff] }
  0x36   : > { %270 = vst [vmem:[%s1800_s25 + $0x30] sm:$0xff] %v269_v6  ;;  %v285_v14 = vld [vmem:[%s1795_s14 + $0xe0] sm:$0xff]  ;;  %v287_v15 = vld [vmem:[%s1795_s14 + $0xe8] sm:$0xff] }
  0x37   : > { %272 = vst [vmem:[%s1800_s25 + $0x38] sm:$0xff] %v271_v7  ;;  %v289_v16 = vld [vmem:[%s1795_s14 + $0x100] sm:$0xff]  ;;  %v291_v17 = vld [vmem:[%s1795_s14 + $0x108] sm:$0xff] }
  0x38   : > { %274 = vst [vmem:[%s1800_s25 + $0x40] sm:$0xff] %v273_v8  ;;  %v293_v18 = vld [vmem:[%s1795_s14 + $0x120] sm:$0xff]  ;;  %v295_v19 = vld [vmem:[%s1795_s14 + $0x128] sm:$0xff] }
  0x39   : > { %276 = vst [vmem:[%s1800_s25 + $0x48] sm:$0xff] %v275_v9  ;;  %v297_v20 = vld [vmem:[%s1795_s14 + $0x140] sm:$0xff]  ;;  %v299_v21 = vld [vmem:[%s1795_s14 + $0x148] sm:$0xff] }
  0x3a   : > { %278 = vst [vmem:[%s1800_s25 + $0x50] sm:$0xff] %v277_v10  ;;  %v301_v22 = vld [vmem:[%s1795_s14 + $0x160] sm:$0xff]  ;;  %v303_v23 = vld [vmem:[%s1795_s14 + $0x168] sm:$0xff] }
  0x3b   : > { %280 = vst [vmem:[%s1800_s25 + $0x58] sm:$0xff] %v279_v11  ;;  %v305_v24 = vld [vmem:[%s1795_s14 + $0x180] sm:$0xff]  ;;  %v307_v25 = vld [vmem:[%s1795_s14 + $0x188] sm:$0xff] }
  0x3c   : > { %282 = vst [vmem:[%s1800_s25 + $0x60] sm:$0xff] %v281_v12  ;;  %v309_v26 = vld [vmem:[%s1795_s14 + $0x1a0] sm:$0xff]  ;;  %v311_v27 = vld [vmem:[%s1795_s14 + $0x1a8] sm:$0xff] }
  0x3d   : > { %284 = vst [vmem:[%s1800_s25 + $0x68] sm:$0xff] %v283_v13  ;;  %v313_v28 = vld [vmem:[%s1795_s14 + $0x1c0] sm:$0xff]  ;;  %v315_v29 = vld [vmem:[%s1795_s14 + $0x1c8] sm:$0xff] }
  0x3e   : > { %286 = vst [vmem:[%s1800_s25 + $0x70] sm:$0xff] %v285_v14  ;;  %v317_v30 = vld [vmem:[%s1795_s14 + $0x1e0] sm:$0xff]  ;;  %v319_v31 = vld [vmem:[%s1795_s14 + $0x1e8] sm:$0xff] }
  0x3f   : > { %288 = vst [vmem:[%s1800_s25 + $0x78] sm:$0xff] %v287_v15 }
  0x40   : > { %290 = vst [vmem:[%s1800_s25 + $0x80] sm:$0xff] %v289_v16 }
  0x41   : > { %292 = vst [vmem:[%s1800_s25 + $0x88] sm:$0xff] %v291_v17 }
  0x42   : > { %294 = vst [vmem:[%s1800_s25 + $0x90] sm:$0xff] %v293_v18 }
  0x43   : > { %296 = vst [vmem:[%s1800_s25 + $0x98] sm:$0xff] %v295_v19 }
  0x44   : > { %298 = vst [vmem:[%s1800_s25 + $0xa0] sm:$0xff] %v297_v20 }
  0x45   : > { %300 = vst [vmem:[%s1800_s25 + $0xa8] sm:$0xff] %v299_v21 }
  0x46   : > { %302 = vst [vmem:[%s1800_s25 + $0xb0] sm:$0xff] %v301_v22 }
  0x47   : > { %304 = vst [vmem:[%s1800_s25 + $0xb8] sm:$0xff] %v303_v23 }
  0x48   : > { %306 = vst [vmem:[%s1800_s25 + $0xc0] sm:$0xff] %v305_v24 }
  0x49   : > { %308 = vst [vmem:[%s1800_s25 + $0xc8] sm:$0xff] %v307_v25 }
  0x4a   : > { %310 = vst [vmem:[%s1800_s25 + $0xd0] sm:$0xff] %v309_v26 }
  0x4b   : > { %312 = vst [vmem:[%s1800_s25 + $0xd8] sm:$0xff] %v311_v27 }
  0x4c   : > { %314 = vst [vmem:[%s1800_s25 + $0xe0] sm:$0xff] %v313_v28 }
  0x4d   : > { %316 = vst [vmem:[%s1800_s25 + $0xe8] sm:$0xff] %v315_v29 }
  0x4e   : > { %318 = vst [vmem:[%s1800_s25 + $0xf0] sm:$0xff] %v317_v30 }
  0x4f   : > { %320 = vst [vmem:[%s1800_s25 + $0xf8] sm:$0xff] %v319_v31 }
  0x50 PF: > { %p1392_p7 = scmp.ge.s32.totalorder %s1679_s9, 1  ;;  %p348_p8 = scmp.lt.s32.totalorder %s1679_s9, 13 }
  0x52   : > { %p349_p9 = pnand %p1392_p7, %p348_p8 }
  0x53   : > { %s355_s26 = sand.u32 (!%p349_p9), 1, %s1655_s29   ;;  %s1394_s28 = sshll.u32 (!%p349_p9), %s1667_s0, 4 }
  0x54   : > { %352 = sbr.rel (%p349_p9) target bundleno = 576 (0x240), region = 55  ;;  %s1393_s12 = sshll.u32 (!%p349_p9), %s355_s26, 8 }
  0x55   : > { %p405_p10 = scmp.lt.s32.totalorder (!%p349_p9), %s1394_s28, 95  ;;  %s422_s13 = sld [smem:[#allocation5 + %s1667_s0]] (!%p349_p9) }
  0x56   : > { %s426_s15 = sld [smem:[#allocation4 + %s1667_s0]] (!%p349_p9)  ;;  %p1403_p13 = scmp.ne.s32.totalorder (!%p349_p9), %s1663_s7, 0 }
  0x57   : > { %s2323_s2 = sld [smem:[#allocation8_spill]] (!%p349_p9) }
  0x58   : > { %s2324_s3 = sld [smem:[#allocation9_spill]] (!%p349_p9) }
  0x59   : > { %s2358_s28 = smov (!%p405_p10, %s1394_s28), 95 }
  0x5a   : > { %s1395_s16 = sshll.u32 %s2358_s28, 3 }
  0x5b   : > { %s1882_s29 = scalar_lea.vmem %s2316_s6, %s1395_s16  ;;  %s423_s14 = smul.u32 %s1663_s7, %s422_s13 }
  0x5c   : > { %s424_s25 = ssub.s32 1, %s422_s13  ;;  %p428_p11 = scmp.lt.s32.totalorder %s426_s15, 3 }
  0x5d   : > { %s1872_s19 = scalar_lea.vmem %s2323_s2, %s1395_s16  ;;  %s425_s26 = sadd.s32 %s424_s25, %s423_s14 }
  0x5e   : > { %s1877_s22 = scalar_lea.vmem %s2324_s3, %s1395_s16  ;;  %s1398_s28 = sshll.u32 %s425_s26, 4 }
  0x5f   : > { %s2360_s15 = smov (!%p428_p11, %s426_s15), 3  ;;  %p430_p12 = scmp.lt.s32.totalorder %s1398_s28, 31 }
  0x60   : > { %s1399_s17 = sshll.u32 %s2360_s15, 5  ;;  %s1890_s3 = scalar_lea.vmem [#allocation6], %s1393_s12 }
  0x61   : > { %s2362_s28 = smov (!%p430_p12, %s1398_s28), 31  ;;  %451 = sbr.rel (%p1403_p13) target bundleno = 119 (0x77), region = 63 }
  0x62   : > { %s433_s18 = sadd.s32 %s1399_s17, %s2362_s28 }
  0x63   : > { %s1400_s2 = sshll.u32 %s433_s18, 3 }
  0x64   : > { %s1888_s21 = scalar_lea.vmem %s2315_s5, %s1400_s2 }
  0x66   : > { %v1683_v32 = vmov 0.0  }
  0x67   : > { %452 = vst [vmem:[#allocation2 + $0x30] sm:$0xff] %v1683_v32 }
  0x68   : > { %453 = vst [vmem:[#allocation2] sm:$0xff] %v1683_v32 }
  0x69   : > { %454 = vst [vmem:[#allocation2 + $0x58] sm:$0xff] %v1683_v32 }
  0x6a   : > { %455 = vst [vmem:[#allocation2 + $0x18] sm:$0xff] %v1683_v32 }
  0x6b   : > { %456 = vst [vmem:[#allocation2 + $0x50] sm:$0xff] %v1683_v32 }
  0x6c   : > { %457 = vst [vmem:[#allocation2 + $0x68] sm:$0xff] %v1683_v32 }
  0x6d   : > { %458 = vst [vmem:[#allocation2 + $0x8] sm:$0xff] %v1683_v32 }
  0x6e   : > { %459 = vst [vmem:[#allocation2 + $0x48] sm:$0xff] %v1683_v32 }
  0x6f   : > { %460 = vst [vmem:[#allocation2 + $0x40] sm:$0xff] %v1683_v32 }
  0x70   : > { %461 = vst [vmem:[#allocation2 + $0x20] sm:$0xff] %v1683_v32 }
  0x71   : > { %462 = vst [vmem:[#allocation2 + $0x10] sm:$0xff] %v1683_v32 }
  0x72   : > { %463 = vst [vmem:[#allocation2 + $0x38] sm:$0xff] %v1683_v32 }
  0x73   : > { %464 = vst [vmem:[#allocation2 + $0x60] sm:$0xff] %v1683_v32 }
  0x74   : > { %465 = vst [vmem:[#allocation2 + $0x70] sm:$0xff] %v1683_v32 }
  0x75   : > { %466 = vst [vmem:[#allocation2 + $0x78] sm:$0xff] %v1683_v32 }
  0x76   : > { %467 = vst [vmem:[#allocation2 + $0x28] sm:$0xff] %v1683_v32 }
  0x77 PF: > { %s468_s2 = sld [smem:[#allocation5 + %s1667_s0]] }
  0x7d   : > { %p1404_p0 = scmp.le.s32.totalorder %s468_s2, 0 }
  0x7f   : > { %472 = sbr.rel (%p1404_p0) target bundleno = 552 (0x228), region = 67 }
  0x84   : > { %v519_v33 = vld [vmem:[%s1890_s3 + $0xf0] sm:$0xff]  ;;  %v517_v34 = vld [vmem:[%s1890_s3 + $0xe0] sm:$0xff]  ;;  %v1684_v36 = vmov 0   ;;  %v1899_v38 = vld [vmem:[%s1890_s3 + $0xf8] sm:$0xff] }
  0x85   : > { %521 = vmatpush.msra.mxu0 %v519_v33  ;;  %1424 = vmatpush.msra.mxu3 %v519_v33  ;;  %v515_v35 = vld [vmem:[%s1890_s3 + $0xd0] sm:$0xff]  ;;  %v513_v37 = vld [vmem:[%s1890_s3 + $0xc0] sm:$0xff]  ;;  %v1904_v40 = vld [vmem:[%s1890_s3 + $0xe8] sm:$0xff] }
  0x86   : > { %1532 = vset.pattern.permute.xlu0 %v1684_v36  ;;  %1533 = vset.pattern.permute.xlu1 %v1684_v36  ;;  %v511_v39 = vld [vmem:[%s1890_s3 + $0xb0] sm:$0xff]  ;;  %v987_v41 = vld [vmem:[%s1877_s22] sm:$0xff]  ;;  %v1908_v42 = vld [vmem:[%s1890_s3 + $0xd8] sm:$0xff] }
  0x87   : > { %522 = vmatpush.msra.mxu0 %v517_v34  ;;  %1425 = vmatpush.msra.mxu3 %v517_v34  ;;  %v509_v43 = vld [vmem:[%s1890_s3 + $0xa0] sm:$0xff]  ;;  %v1913_v44 = vld [vmem:[%s1890_s3 + $0xc8] sm:$0xff]  ;;  %v507_v45 = vld [vmem:[%s1890_s3 + $0x90] sm:$0xff] }
  0x88   : > { %1534 = vset.pattern.permute.xlu2 %v1684_v36  ;;  %586 = vmatpush.msra.mxu1 %v1899_v38  ;;  %v1918_v46 = vld [vmem:[%s1890_s3 + $0xb8] sm:$0xff]  ;;  %v505_v47 = vld [vmem:[%s1890_s3 + $0x80] sm:$0xff]  ;;  %v1923_v48 = vld [vmem:[%s1890_s3 + $0xa8] sm:$0xff] }
  0x89   : > { %523 = vmatpush.msra.mxu0 %v515_v35  ;;  %1426 = vmatpush.msra.mxu3 %v515_v35  ;;  %v988_v49 = vld [vmem:[%s1877_s22 + $0x8] sm:$0xff]  ;;  %v503_v50 = vld [vmem:[%s1890_s3 + $0x70] sm:$0xff]  ;;  %v1929_v51 = vld [vmem:[%s1890_s3 + $0x98] sm:$0xff] }
  0x8a   : > { %587 = vmatpush.msra.mxu1 %v1904_v40  ;;  %1005 = vperm.xlu0 %1532, %v987_v41   ;;  %v501_v52 = vld [vmem:[%s1890_s3 + $0x60] sm:$0xff]  ;;  %v1934_v53 = vld [vmem:[%s1890_s3 + $0x88] sm:$0xff]  ;;  %v499_v54 = vld [vmem:[%s1890_s3 + $0x50] sm:$0xff] }
  0x8b   : > { %524 = vmatpush.msra.mxu0 %v513_v37  ;;  %1427 = vmatpush.msra.mxu3 %v513_v37  ;;  %v1939_v55 = vld [vmem:[%s1890_s3 + $0x78] sm:$0xff]  ;;  %v497_v56 = vld [vmem:[%s1890_s3 + $0x40] sm:$0xff]  ;;  %v1944_v57 = vld [vmem:[%s1890_s3 + $0x68] sm:$0xff] }
  0x8c   : > { %588 = vmatpush.msra.mxu1 %v1908_v42  ;;  %v993_v58 = vld [vmem:[%s1877_s22 + $0x30] sm:$0xff]  ;;  %v500_v60 = vld [vmem:[%s1890_s3 + $0x58] sm:$0xff]  ;;  %v493_v61 = vld [vmem:[%s1890_s3 + $0x20] sm:$0xff] }
  0x8d   : > { %525 = vmatpush.msra.mxu0 %v511_v39  ;;  %1428 = vmatpush.msra.mxu3 %v511_v39  ;;  %v495_v59 = vld [vmem:[%s1890_s3 + $0x30] sm:$0xff]  ;;  %v498_v62 = vld [vmem:[%s1890_s3 + $0x48] sm:$0xff]  ;;  %v496_v1 = vld [vmem:[%s1890_s3 + $0x38] sm:$0xff] }
  0x8e   : > { %589 = vmatpush.msra.mxu1 %v1913_v44  ;;  %v989_v63 = vld [vmem:[%s1877_s22 + $0x10] sm:$0xff]  ;;  %v489_v2 = vld [vmem:[%s1890_s3] sm:$0xff]  ;;  %v494_v5 = vld [vmem:[%s1890_s3 + $0x28] sm:$0xff] }
  0x8f   : > { %526 = vmatpush.msra.mxu0 %v509_v43  ;;  %1429 = vmatpush.msra.mxu3 %v509_v43  ;;  %v491_v0 = vld [vmem:[%s1890_s3 + $0x10] sm:$0xff]  ;;  %v473_v3 = vld [vmem:[%s1872_s19] sm:$0xff]  ;;  %v492_v7 = vld [vmem:[%s1890_s3 + $0x18] sm:$0xff] }
  0x90   : > { %590 = vmatpush.msra.mxu1 %v1918_v46  ;;  %1015 = vperm.xlu1 %1533, %v989_v63   ;;  %v485_v4 = vld [vmem:[%s1872_s19 + $0x60] sm:$0xff]  ;;  %v990_v8 = vld [vmem:[%s1877_s22 + $0x18] sm:$0xff]  ;;  %v490_v9 = vld [vmem:[%s1890_s3 + $0x8] sm:$0xff] }
  0x91   : > { %527 = vmatpush.msra.mxu0 %v507_v45  ;;  %1430 = vmatpush.msra.mxu3 %v507_v45  ;;  %v999_v6 = vld [vmem:[%s1877_s22 + $0x60] sm:$0xff]  ;;  %v474_v10 = vld [vmem:[%s1872_s19 + $0x8] sm:$0xff]  ;;  %v997_v12 = vld [vmem:[%s1877_s22 + $0x50] sm:$0xff] }
  0x92   : > { %591 = vmatpush.msra.mxu1 %v1923_v48  ;;  %1010 = vperm.xlu0 %1532, %v988_v49   ;;  %v486_v11 = vld [vmem:[%s1872_s19 + $0x68] sm:$0xff]  ;;  %v994_v13 = vld [vmem:[%s1877_s22 + $0x38] sm:$0xff]  ;;  %v475_v14 = vld [vmem:[%s1872_s19 + $0x10] sm:$0xff] }
  0x93   : > { %528 = vmatpush.msra.mxu0 %v505_v47  ;;  %1431 = vmatpush.msra.mxu3 %v505_v47  ;;  %v487_v15 = vld [vmem:[%s1872_s19 + $0x70] sm:$0xff]  ;;  %v1002_v16 = vld [vmem:[%s1877_s22 + $0x78] sm:$0xff]  ;;  %v996_v17 = vld [vmem:[%s1877_s22 + $0x48] sm:$0xff] }
  0x94   : > { %592 = vmatpush.msra.mxu1 %v1929_v51  ;;  %v476_v18 = vld [vmem:[%s1872_s19 + $0x18] sm:$0xff]  ;;  %v991_v20 = vld [vmem:[%s1877_s22 + $0x20] sm:$0xff]  ;;  %v1001_v21 = vld [vmem:[%s1877_s22 + $0x70] sm:$0xff] }
  0x95   : > { %529 = vmatpush.msra.mxu0 %v503_v50  ;;  %1432 = vmatpush.msra.mxu3 %v503_v50  ;;  %v488_v19 = vld [vmem:[%s1872_s19 + $0x78] sm:$0xff]  ;;  %v477_v22 = vld [vmem:[%s1872_s19 + $0x20] sm:$0xff]  ;;  %v992_v23 = vld [vmem:[%s1877_s22 + $0x28] sm:$0xff] }
  0x96   : > { %593 = vmatpush.msra.mxu1 %v1934_v53  ;;  %1025 = vperm.xlu2 %1534, %v991_v20   ;;  %v478_v24 = vld [vmem:[%s1872_s19 + $0x28] sm:$0xff]  ;;  %v995_v25 = vld [vmem:[%s1877_s22 + $0x40] sm:$0xff]  ;;  %v479_v26 = vld [vmem:[%s1872_s19 + $0x30] sm:$0xff] }
  0x97   : > { %530 = vmatpush.msra.mxu0 %v501_v52  ;;  %1433 = vmatpush.msra.mxu3 %v501_v52  ;;  %v1000_v27 = vld [vmem:[%s1877_s22 + $0x68] sm:$0xff]  ;;  %v480_v28 = vld [vmem:[%s1872_s19 + $0x38] sm:$0xff]  ;;  %v481_v30 = vld [vmem:[%s1872_s19 + $0x40] sm:$0xff] }
  0x98   : > { %594 = vmatpush.msra.mxu1 %v1939_v55  ;;  %1020 = vperm.xlu1 %1533, %v990_v8   ;;  %v998_v29 = vld [vmem:[%s1877_s22 + $0x58] sm:$0xff]  ;;  %v482_v31 = vld [vmem:[%s1872_s19 + $0x48] sm:$0xff]  ;;  %v483_v32 = vld [vmem:[%s1872_s19 + $0x50] sm:$0xff] }
  0x99   : > { %531 = vmatpush.msra.mxu0 %v499_v54  ;;  %1434 = vmatpush.msra.mxu3 %v499_v54  ;;  %v484_v33 = vld [vmem:[%s1872_s19 + $0x58] sm:$0xff]  ;;  %v1129_v35 = vld [vmem:[%s1888_s21 + $0x70] sm:$0xff]  ;;  %v1128_v36 = vld [vmem:[%s1888_s21 + $0x68] sm:$0xff] }
  0x9a   : > { %595 = vmatpush.msra.mxu1 %v1944_v57  ;;  %1035 = vperm.xlu0 %1532, %v993_v58   ;;  %v1130_v34 = vld [vmem:[%s1888_s21 + $0x78] sm:$0xff]  ;;  %v1127_v37 = vld [vmem:[%s1888_s21 + $0x60] sm:$0xff]  ;;  %v1125_v39 = vld [vmem:[%s1888_s21 + $0x50] sm:$0xff] }
  0x9b   : > { %532 = vmatpush.msra.mxu0 %v497_v56  ;;  %1435 = vmatpush.msra.mxu3 %v497_v56  ;;  %v1123_v41 = vld [vmem:[%s1888_s21 + $0x40] sm:$0xff]  ;;  %v1121_v43 = vld [vmem:[%s1888_s21 + $0x30] sm:$0xff]  ;;  %v1118_v47 = vld [vmem:[%s1888_s21 + $0x18] sm:$0xff] }
  0x9c   : > { %596 = vmatpush.msra.mxu1 %v500_v60  ;;  %1131 = vmatpush.msra.mxu2 %v1130_v34  ;;  %v1119_v45 = vld [vmem:[%s1888_s21 + $0x20] sm:$0xff]  ;;  %v1117_v49 = vld [vmem:[%s1888_s21 + $0x10] sm:$0xff]  ;;  %v1116_v50 = vld [vmem:[%s1888_s21 + $0x8] sm:$0xff] }
  0x9d   : > { %533 = vmatpush.msra.mxu0 %v495_v59  ;;  %1436 = vmatpush.msra.mxu3 %v495_v59  ;;  %v1115_v52 = vld [vmem:[%s1888_s21] sm:$0xff] }
  0x9e   : > { %597 = vmatpush.msra.mxu1 %v498_v62  ;;  %1030 = vperm.xlu2 %1534, %v992_v23  }
  0x9f   : > { %534 = vmatpush.msra.mxu0 %v493_v61  ;;  %1437 = vmatpush.msra.mxu3 %v493_v61 }
  0xa0   : > { %598 = vmatpush.msra.mxu1 %v496_v1  ;;  %1040 = vperm.xlu1 %1533, %v994_v13  }
  0xa1   : > { %535 = vmatpush.msra.mxu0 %v491_v0  ;;  %1438 = vmatpush.msra.mxu3 %v491_v0 }
  0xa2   : > { %599 = vmatpush.msra.mxu1 %v494_v5  ;;  %1065 = vperm.xlu0 %1532, %v999_v6  }
  0xa3   : > { %536 = vmatpush.msra.mxu0 %v489_v2  ;;  %1439 = vmatpush.msra.mxu3 %v489_v2 }
  0xa4   : > { %537 = vmatmul.f32.vlgmr.msra.gmra.mxu0 %v473_v3  ;;  %573 = vmatmul.f32.vlgmr.msra.gmra.mxu3 %v485_v4 }
  0xa5   : > { %1440 = vmatpush.msrb.mxu3 %v1899_v38  ;;  %600 = vmatpush.msra.mxu1 %v492_v7  ;;  %v1126_v38 = vld [vmem:[%s1888_s21 + $0x58] sm:$0xff] }
  0xa6   : > { %1045 = vperm.xlu2 %1534, %v995_v25   ;;  %1132 = vmatpush.msra.mxu2 %v1129_v35 }
  0xa7   : > { %1441 = vmatpush.msrb.mxu3 %v1904_v40  ;;  %601 = vmatpush.msra.mxu1 %v490_v9  ;;  %v1124_v40 = vld [vmem:[%s1888_s21 + $0x48] sm:$0xff] }
  0xa8   : > { %602 = vmatmul.f32.vlgmr.msra.gmra.mxu1 %v473_v3  ;;  %1050 = vperm.xlu1 %1533, %v996_v17  }
  0xa9   : > { %1442 = vmatpush.msrb.mxu3 %v1908_v42  ;;  %1133 = vmatpush.msra.mxu2 %v1128_v36  ;;  %v1122_v42 = vld [vmem:[%s1888_s21 + $0x38] sm:$0xff] }
  0xaa   : > { %1055 = vperm.xlu0 %1532, %v997_v12  }
  0xab   : > { %1443 = vmatpush.msrb.mxu3 %v1913_v44  ;;  %1134 = vmatpush.msra.mxu2 %v1127_v37  ;;  %v1120_v44 = vld [vmem:[%s1888_s21 + $0x28] sm:$0xff] }
  0xac   : > { %540 = vmatmul.f32.gmra.mxu0 %v474_v10  ;;  %576 = vmatmul.f32.gmra.mxu3 %v486_v11 }
  0xad   : > { %1444 = vmatpush.msrb.mxu3 %v1918_v46  ;;  %1135 = vmatpush.msra.mxu2 %v1126_v38 }
  0xae   : > { %1070 = vperm.xlu2 %1534, %v1000_v27  }
  0xaf   : > { %1445 = vmatpush.msrb.mxu3 %v1923_v48  ;;  %1136 = vmatpush.msra.mxu2 %v1125_v39 }
  0xb0   : > { %605 = vmatmul.f32.gmra.mxu1 %v474_v10  ;;  %1075 = vperm.xlu1 %1533, %v1001_v21  }
  0xb1   : > { %1446 = vmatpush.msrb.mxu3 %v1929_v51  ;;  %1137 = vmatpush.msra.mxu2 %v1124_v40 }
  0xb2   : > { %1080 = vperm.xlu0 %1532, %v1002_v16  }
  0xb3   : > { %1447 = vmatpush.msrb.mxu3 %v1934_v53  ;;  %1138 = vmatpush.msra.mxu2 %v1123_v41 }
  0xb4   : > { %543 = vmatmul.f32.gmra.mxu0 %v475_v14  ;;  %579 = vmatmul.f32.gmra.mxu3 %v487_v15 }
  0xb5   : > { %1448 = vmatpush.msrb.mxu3 %v1939_v55  ;;  %1139 = vmatpush.msra.mxu2 %v1122_v42 }
  0xb6   : > { %1060 = vperm.xlu2 %1534, %v998_v29  }
  0xb7   : > { %1449 = vmatpush.msrb.mxu3 %v1944_v57  ;;  %1140 = vmatpush.msra.mxu2 %v1121_v43 }
  0xb8   : > { %608 = vmatmul.f32.gmra.mxu1 %v475_v14 }
  0xb9   : > { %1450 = vmatpush.msrb.mxu3 %v500_v60  ;;  %1141 = vmatpush.msra.mxu2 %v1120_v44 }
  0xbb   : > { %1451 = vmatpush.msrb.mxu3 %v498_v62  ;;  %1142 = vmatpush.msra.mxu2 %v1119_v45 }
  0xbc   : > { %546 = vmatmul.f32.gmra.mxu0 %v476_v18  ;;  %582 = vmatmul.f32.gmra.mxu3 %v488_v19 }
  0xbd   : > { %1452 = vmatpush.msrb.mxu3 %v496_v1  ;;  %1143 = vmatpush.msra.mxu2 %v1118_v47 }
  0xbf   : > { %1453 = vmatpush.msrb.mxu3 %v494_v5  ;;  %1144 = vmatpush.msra.mxu2 %v1117_v49 }
  0xc0   : > { %611 = vmatmul.f32.gmra.mxu1 %v476_v18 }
  0xc1   : > { %1454 = vmatpush.msrb.mxu3 %v492_v7  ;;  %1145 = vmatpush.msra.mxu2 %v1116_v50 }
  0xc3   : > { %1455 = vmatpush.msrb.mxu3 %v490_v9  ;;  %1146 = vmatpush.msra.mxu2 %v1115_v52 }
  0xc4   : > { %549 = vmatmul.f32.gmra.mxu0 %v477_v22  ;;  %638 = vmatmul.f32.vlgmr.msrb.gmra.mxu3 %v485_v4 }
  0xc5   : > { %1456 = vmatpush.msra.mxu3 %v1130_v34 }
  0xc7   : > { %1457 = vmatpush.msra.mxu3 %v1129_v35 }
  0xc8   : > { %614 = vmatmul.f32.gmra.mxu1 %v477_v22 }
  0xc9   : > { %1458 = vmatpush.msra.mxu3 %v1128_v36 }
  0xcb   : > { %1459 = vmatpush.msra.mxu3 %v1127_v37 }
  0xcc   : > { %552 = vmatmul.f32.gmra.mxu0 %v478_v24  ;;  %641 = vmatmul.f32.gmra.mxu3 %v486_v11 }
  0xcd   : > { %1460 = vmatpush.msra.mxu3 %v1126_v38 }
  0xcf   : > { %1461 = vmatpush.msra.mxu3 %v1125_v39 }
  0xd0   : > { %617 = vmatmul.f32.gmra.mxu1 %v478_v24 }
  0xd1   : > { %1462 = vmatpush.msra.mxu3 %v1124_v40 }
  0xd3   : > { %1463 = vmatpush.msra.mxu3 %v1123_v41 }
  0xd4   : > { %555 = vmatmul.f32.gmra.mxu0 %v479_v26  ;;  %644 = vmatmul.f32.gmra.mxu3 %v487_v15 }
  0xd5   : > { %1464 = vmatpush.msra.mxu3 %v1122_v42 }
  0xd7   : > { %1465 = vmatpush.msra.mxu3 %v1121_v43 }
  0xd8   : > { %620 = vmatmul.f32.gmra.mxu1 %v479_v26 }
  0xd9   : > { %1466 = vmatpush.msra.mxu3 %v1120_v44 }
  0xdb   : > { %1467 = vmatpush.msra.mxu3 %v1119_v45 }
  0xdc   : > { %558 = vmatmul.f32.gmra.mxu0 %v480_v28  ;;  %647 = vmatmul.f32.gmra.mxu3 %v488_v19 }
  0xdd   : > { %1468 = vmatpush.msra.mxu3 %v1118_v47 }
  0xdf   : > { %1469 = vmatpush.msra.mxu3 %v1117_v49 }
  0xe0   : > { %623 = vmatmul.f32.gmra.mxu1 %v480_v28 }
  0xe1   : > { %1470 = vmatpush.msra.mxu3 %v1116_v50 }
  0xe3   : > { %1471 = vmatpush.msra.mxu3 %v1115_v52 }
  0xe4   : > { %561 = vmatmul.f32.gmra.mxu0 %v481_v30 }
  0xe8   : > { %626 = vmatmul.f32.gmra.mxu1 %v481_v30 }
  0xec   : > { %564 = vmatmul.f32.gmra.mxu0 %v482_v31 }
  0xf0   : > { %629 = vmatmul.f32.gmra.mxu1 %v482_v31  ;;  %v2040_v11 = vpop.permute.xlu2 %1025 }
  0xf4   : > { %567 = vmatmul.f32.gmra.mxu0 %v483_v32 }
  0xf8   : > { %632 = vmatmul.f32.gmra.mxu1 %v483_v32  ;;  %v2084_v49 = vpop.permute.xlu2 %1030 }
  0xfc   : > { %570 = vmatmul.f32.gmra.mxu0 %v484_v33  ;;  %v2027_v61 = vpop.permute.xlu0 %1005 }
 0x100   : > { %635 = vmatmul.f32.gmra.mxu1 %v484_v33 }
 0x102   : > { %v2035_v6 = vpop.permute.xlu1 %1015 }
 0x104   : > { %v2053_v22 = vpop.permute.xlu0 %1010 }
 0x10a   : > { %v2068_v37 = vpop.permute.xlu1 %1020 }
 0x121   : > { %v2010_v46 = vpop.f32.mrf.mxu0 }
 0x122   : > { %v1405_v48 = vmul.f32 -1.442695, %v2010_v46 }
 0x124   : > { %1535 = vpow2.f32 %v1405_v48 }
 0x125   : > { %v2023_v58 = vpop.f32.mrf.mxu1 }
 0x127   : > { %v2016_v51 = vpop.f32.mrf.mxu3 }
 0x128   : > { %v1417_v53 = vmul.f32 -1.442695, %v2016_v51 }
 0x129   : > { %v2020_v54 = vpop.f32.mrf.mxu0 }
 0x12a   : > { %v1536_v55 = vpop.eup %1535  ;;  %1537 = vpow2.f32 %v1417_v53  ;;  %v1406_v56 = vmul.f32 -1.442695, %v2020_v54 }
 0x12b   : > { %v699_v57 = vadd.f32 1.0, %v1536_v55 }
 0x12c   : > { %1539 = vpow2.f32 %v1406_v56 }
 0x12d   : > { %1541 = vrcp.f32 %v699_v57  ;;  %v724_v7 = vand.u32 2147483647, %v699_v57  ;;  %v726_v8 = vand.u32 2147483648, %v699_v57  ;;  %v2037_v9 = vpop.f32.mrf.mxu1  ;;  %vm720_vm1 = vweird.f32 %v699_v57 }
 0x12f   : > { %v2025_v59 = vpop.f32.mrf.mxu3  ;;  %vm2045_vm2 = vcmp.eq.f32.partialorder %v724_v7, 8.507059e+37  ;;  %v727_v18 = vor.u32 1.1754944e-38, %v726_v8 }
 0x130   : > { %v1538_v60 = vpop.eup %1537  ;;  %v1418_v62 = vmul.f32 -1.442695, %v2025_v59 }
 0x131   : > { %v711_v63 = vadd.f32 1.0, %v1538_v60  ;;  %v2030_v0 = vpop.f32.mrf.mxu0 }
 0x132   : > { %v1540_v1 = vpop.eup %1539  ;;  %1543 = vpow2.f32 %v1418_v62  ;;  %v1407_v2 = vmul.f32 -1.442695, %v2030_v0 }
 0x133   : > { %v1542_v3 = vpop.eup %1541  ;;  %1545 = vrcp.f32 %v711_v63  ;;  %v2033_v5 = vadd.f32 1.0, %v1540_v1  ;;  %v904_v25 = vand.u32 2147483647, %v711_v63  ;;  %vm900_vm4 = vweird.f32 %v711_v63 }
 0x134   : > { %v716_v4 = vmul.f32 %v1542_v3, %v699_v57  ;;  %1547 = vpow2.f32 %v1407_v2  ;;  %vm721_vm0 = vweird.f32 %v1542_v3  ;;  %v906_v26 = vand.u32 2147483648, %v711_v63  ;;  %v2105_v2 = vpop.permute.xlu0 %1035 }
 0x135   : > { %1549 = vrcp.f32 %v2033_v5  ;;  %vm722_vm3 = vmor %vm720_vm1, %vm721_vm0  ;;  %v739_v34 = vand.u32 2147483647, %v2033_v5  ;;  %vm2063_vm6 = vcmp.eq.f32.partialorder %v904_v25, 8.507059e+37  ;;  %vm735_vm8 = vweird.f32 %v2033_v5  ;;  %v2080_v43 = vpop.f32.mrf.mxu1 }
 0x136   : > { %v717_v10 = vsub.f32 1.0, %v716_v4  ;;  %v907_v39 = vor.u32 1.1754944e-38, %v906_v26  ;;  %v741_v41 = vand.u32 2147483648, %v2033_v5 }
 0x137   : > { %v2042_v12 = vpop.f32.mrf.mxu3  ;;  %vm2088_vm10 = vcmp.eq.f32.partialorder %v739_v34, 8.507059e+37 }
 0x138   : > { %v1544_v13 = vpop.eup %1543  ;;  %v718_v14 = vmul.f32 %v1542_v3, %v717_v10  ;;  %v1419_v15 = vmul.f32 -1.442695, %v2042_v12  ;;  %v742_v10 = vor.u32 1.1754944e-38, %v741_v41 }
 0x139   : > { %v1546_v16 = vpop.eup %1545  ;;  %v2049_v19 = vadd.f32 1.0, %v1544_v13  ;;  %v2051_v20 = vpop.f32.mrf.mxu0 }
 0x13a   : > { %v1548_v21 = vpop.eup %1547  ;;  %v719_v23 = vadd.f32 %v1542_v3, %v718_v14  ;;  %v896_v24 = vmul.f32 %v1546_v16, %v711_v63  ;;  %1551 = vpow2.f32 %v1419_v15  ;;  %vm901_vm5 = vweird.f32 %v1546_v16 }
 0x13b   : > { %1553 = vrcp.f32 %v2049_v19  ;;  %v1550_v27 = vpop.eup %1549  ;;  %v2056_v30 = vadd.f32 1.0, %v1548_v21  ;;  %v1408_v31 = vmul.f32 -1.442695, %v2051_v20  ;;  %vm2072_vm7 = vmor %vm900_vm4, %vm901_vm5  ;;  %v919_v60 = vand.u32 2147483647, %v2049_v19 }
 0x13c   : > { %v723_v28 = vsel %vm722_vm3, %v1542_v3, %v719_v23  ;;  %v897_v29 = vsub.f32 1.0, %v896_v24  ;;  %v731_v33 = vmul.f32 %v1550_v27, %v2033_v5  ;;  %vm736_vm9 = vweird.f32 %v1550_v27  ;;  %v1066_v53 = vpop.permute.xlu0 %1065 }
 0x13d   : > { %v728_v32 = vsel %vm2045_vm2, %v727_v18, %v723_v28  ;;  %1555 = vrcp.f32 %v2056_v30  ;;  %vm915_vm11 = vweird.f32 %v2049_v19  ;;  %vm737_vm12 = vmor %vm735_vm8, %vm736_vm9  ;;  %v921_v4 = vand.u32 2147483648, %v2049_v19  ;;  %v2133_v28 = vpop.permute.xlu1 %1040  ;;  %v2140_v34 = vpop.f32.mrf.mxu1 }
 0x13e   : > { %v898_v35 = vmul.f32 %v1546_v16, %v897_v29  ;;  %v732_v40 = vsub.f32 1.0, %v731_v33  ;;  %v955_v45 = vmul.f32 %v728_v32, %v2010_v46  ;;  %1557 = vpow2.f32 %v1408_v31 }
 0x13f   : > { %v2078_v42 = vpop.f32.mrf.mxu3  ;;  %vm2116_vm14 = vcmp.eq.f32.partialorder %v919_v60, 8.507059e+37  ;;  %v756_v18 = vand.u32 2147483648, %v2056_v30  ;;  %vm750_vm0 = vweird.f32 %v2056_v30  ;;  %v754_v32 = vand.u32 2147483647, %v2056_v30 }
 0x140   : > { %v1552_v44 = vpop.eup %1551  ;;  %v899_v47 = vadd.f32 %v1546_v16, %v898_v35  ;;  %v1420_v48 = vmul.f32 -1.442695, %v2078_v42  ;;  %v733_v52 = vmul.f32 %v1550_v27, %v732_v40  ;;  %v971_v7 = vmul.f32 %v955_v45, %v2023_v58 }
 0x141   : > { %v2086_v50 = vpop.eup %1553  ;;  %v2092_v55 = vadd.f32 1.0, %v1552_v44  ;;  %v2094_v56 = vpop.f32.mrf.mxu0  ;;  %v757_v38 = vor.u32 1.1754944e-38, %v756_v18  ;;  %vm755_vm5 = vcmp.eq.f32.partialorder %v754_v32, 8.507059e+37 }
 0x142   : > { %v903_v46 = vsel %vm2072_vm7, %v1546_v16, %v899_v47  ;;  %v911_v57 = vmul.f32 %v2086_v50, %v2049_v19  ;;  %1559 = vpow2.f32 %v1420_v48  ;;  %v734_v63 = vadd.f32 %v1550_v27, %v733_v52 }
 0x143   : > { %v908_v62 = vsel %vm2063_vm6, %v907_v39, %v903_v46  ;;  %1561 = vrcp.f32 %v2092_v55  ;;  %v1556_v1 = vpop.eup %1555  ;;  %vm916_vm13 = vweird.f32 %v2086_v50  ;;  %v1409_v14 = vmul.f32 -1.442695, %v2094_v56  ;;  %v2147_v39 = vpop.permute.xlu2 %1045 }
 0x144   : > { %v912_v3 = vsub.f32 1.0, %v911_v57  ;;  %v738_v8 = vsel %vm737_vm12, %v1550_v27, %v734_v63  ;;  %v746_v13 = vmul.f32 %v1556_v1, %v2056_v30  ;;  %v1558_v15 = vpop.eup %1557  ;;  %v967_v16 = vmul.f32 %v908_v62, %v2016_v51  ;;  %vm2125_vm15 = vmor %vm915_vm11, %vm916_vm13 }
 0x145   : > { %v743_v58 = vsel %vm2088_vm10, %v742_v10, %v738_v8  ;;  %v2129_v24 = vadd.f32 1.0, %v1558_v15  ;;  %1563 = vpow2.f32 %v1409_v14  ;;  %v922_v27 = vor.u32 1.1754944e-38, %v921_v4 }
 0x146   : > { %v913_v17 = vmul.f32 %v2086_v50, %v912_v3  ;;  %v747_v23 = vsub.f32 1.0, %v746_v13  ;;  %v1083_v29 = vmul.f32 %v2027_v61, %v971_v7  ;;  %vm751_vm1 = vweird.f32 %v1556_v1 }
 0x147   : > { %v639_v51 = vpop.f32.mrf.mxu3  ;;  %1565 = vrcp.f32 %v2129_v24  ;;  %v956_v35 = vmul.f32 %v743_v58, %v2020_v54  ;;  %v936_v41 = vand.u32 2147483648, %v2092_v55  ;;  %vm752_vm2 = vmor %vm750_vm0, %vm751_vm1  ;;  %vm930_vm3 = vweird.f32 %v2092_v55 }
 0x148   : > { %v1560_v25 = vpop.eup %1559  ;;  %v914_v26 = vadd.f32 %v2086_v50, %v913_v17  ;;  %v748_v31 = vmul.f32 %v1556_v1, %v747_v23  ;;  %1147 = vmatmul.f32.vlgmr.msra.gmra.mxu2 %v1083_v29  ;;  %v983_v45 = vmul.f32 %v967_v16, %v639_v51  ;;  %v934_v47 = vand.u32 2147483647, %v2092_v55  ;;  %v2178_v17 = vpop.permute.xlu1 %1050 }
 0x149   : > { %v1562_v19 = vpop.eup %1561  ;;  %v2138_v33 = vpop.f32.mrf.mxu0  ;;  %v2150_v44 = vadd.f32 1.0, %v1560_v25  ;;  %v972_v30 = vmul.f32 %v956_v35, %v2037_v9  ;;  %v769_v3 = vand.u32 2147483647, %v2129_v24  ;;  %vm765_vm8 = vweird.f32 %v2129_v24 }
 0x14a   : > { %v918_v36 = vsel %vm2125_vm15, %v2086_v50, %v914_v26  ;;  %v926_v61 = vmul.f32 %v1562_v19, %v2092_v55  ;;  %v749_v40 = vadd.f32 %v1556_v1, %v748_v31  ;;  %vm931_vm4 = vweird.f32 %v1562_v19  ;;  %v2187_v23 = vpop.f32.mrf.mxu1 }
 0x14b   : > { %v1564_v48 = vpop.eup %1563  ;;  %v923_v50 = vsel %vm2116_vm14, %v922_v27, %v918_v36  ;;  %1567 = vrcp.f32 %v2150_v44  ;;  %vm2163_vm6 = vmor %vm930_vm3, %vm931_vm4  ;;  %v937_v55 = vor.u32 1.1754944e-38, %v936_v41  ;;  %v1095_v4 = vmul.f32 %v1066_v53, %v983_v45 }
 0x14c   : > { %v927_v54 = vsub.f32 1.0, %v926_v61  ;;  %v753_v52 = vsel %vm752_vm2, %v1556_v1, %v749_v40  ;;  %v2160_v60 = vadd.f32 1.0, %v1564_v48  ;;  %v1410_v1 = vmul.f32 -1.442695, %v2138_v33 }
 0x14d   : > { %v758_v46 = vsel %vm755_vm5, %v757_v38, %v753_v52  ;;  %v1566_v62 = vpop.eup %1565  ;;  %vm935_vm7 = vcmp.eq.f32.partialorder %v934_v47, 8.507059e+37  ;;  %v968_v9 = vmul.f32 %v923_v50, %v2025_v59  ;;  %1183 = vmatmul.f32.vlgmr.msra.gmra.mxu3 %v1095_v4  ;;  %vm2181_vm9 = vcmp.eq.f32.partialorder %v769_v3, 8.507059e+37 }
 0x14e   : > { %v928_v57 = vmul.f32 %v1562_v19, %v927_v54  ;;  %v957_v8 = vmul.f32 %v758_v46, %v2030_v0  ;;  %v761_v13 = vmul.f32 %v1566_v62, %v2129_v24  ;;  %1569 = vrcp.f32 %v2160_v60 }
 0x14f   : > { %v642_v7 = vpop.f32.mrf.mxu3  ;;  %1571 = vpow2.f32 %v1410_v1  ;;  %v1084_v0 = vmul.f32 %v2053_v22, %v972_v30  ;;  %v771_v58 = vand.u32 2147483648, %v2129_v24  ;;  %v949_v21 = vand.u32 2147483647, %v2150_v44  ;;  %v1071_v22 = vpop.permute.xlu2 %1070 }
 0x150   : > { %v929_v10 = vadd.f32 %v1562_v19, %v928_v57  ;;  %v762_v16 = vsub.f32 1.0, %v761_v13  ;;  %vm766_vm10 = vweird.f32 %v1566_v62  ;;  %v973_v26 = vmul.f32 %v957_v8, %v2080_v43  ;;  %v2215_v57 = vpop.permute.xlu0 %1055  ;;  %v1076_v1 = vpop.permute.xlu1 %1075 }
 0x151   : > { %v2174_v14 = vpop.f32.mrf.mxu0  ;;  %v1568_v5 = vpop.eup %1567  ;;  %1150 = vmatmul.f32.gmra.mxu2 %v1084_v0  ;;  %v951_v29 = vand.u32 2147483648, %v2150_v44  ;;  %vm945_vm11 = vweird.f32 %v2150_v44  ;;  %vm767_vm13 = vmor %vm765_vm8, %vm766_vm10  ;;  %v772_v38 = vor.u32 1.1754944e-38, %v771_v58  ;;  %vm2197_vm14 = vcmp.eq.f32.partialorder %v949_v21, 8.507059e+37 }
 0x152   : > { %v933_v15 = vsel %vm2163_vm6, %v1562_v19, %v929_v10  ;;  %v763_v51 = vmul.f32 %v1566_v62, %v762_v16  ;;  %v941_v25 = vmul.f32 %v1568_v5, %v2150_v44  ;;  %v984_v19 = vmul.f32 %v968_v9, %v642_v7  ;;  %v2227_v13 = vpop.f32.mrf.mxu1 }
 0x153   : > { %v938_v18 = vsel %vm935_vm7, %v937_v55, %v933_v15  ;;  %v1411_v31 = vmul.f32 -1.442695, %v2174_v14  ;;  %vm946_vm12 = vweird.f32 %v1568_v5  ;;  %v1085_v47 = vmul.f32 %v2035_v6, %v973_v26 }
 0x154   : > { %v969_v27 = vmul.f32 %v938_v18, %v2042_v12  ;;  %v764_v32 = vadd.f32 %v1566_v62, %v763_v51  ;;  %v942_v35 = vsub.f32 1.0, %v941_v25  ;;  %v1570_v36 = vpop.eup %1569  ;;  %v1096_v12 = vmul.f32 %v1071_v22, %v984_v19  ;;  %vm2207_vm15 = vmor %vm945_vm11, %vm946_vm12 }
 0x155   : > { %1573 = vpow2.f32 %v1411_v31  ;;  %v1572_v40 = vpop.eup %1571  ;;  %v776_v54 = vmul.f32 %v1570_v36, %v2160_v60  ;;  %v952_v50 = vor.u32 1.1754944e-38, %v951_v29  ;;  %vm781_vm0 = vweird.f32 %v1570_v36 }
 0x156   : > { %v768_v41 = vsel %vm767_vm13, %v1566_v62, %v764_v32  ;;  %v943_v45 = vmul.f32 %v1568_v5, %v942_v35  ;;  %v2211_v52 = vadd.f32 1.0, %v1572_v40  ;;  %1186 = vmatmul.f32.gmra.mxu3 %v1096_v12  ;;  %v784_v44 = vand.u32 2147483647, %v2160_v60 }
 0x157   : > { %v645_v61 = vpop.f32.mrf.mxu3  ;;  %v773_v48 = vsel %vm2181_vm9, %v772_v38, %v768_v41  ;;  %v777_v62 = vsub.f32 1.0, %v776_v54  ;;  %v786_v55 = vand.u32 2147483648, %v2160_v60  ;;  %vm780_vm1 = vweird.f32 %v2160_v60 }
 0x158   : > { %v985_v53 = vmul.f32 %v969_v27, %v645_v61  ;;  %v958_v6 = vmul.f32 %v773_v48, %v2051_v20  ;;  %v944_v30 = vadd.f32 %v1568_v5, %v943_v45  ;;  %1575 = vrcp.f32 %v2211_v52  ;;  %vm782_vm2 = vmor %vm780_vm1, %vm781_vm0  ;;  %v1081_v27 = vpop.permute.xlu0 %1080 }
 0x159   : > { %v2213_v46 = vpop.f32.mrf.mxu0  ;;  %v778_v4 = vmul.f32 %v1570_v36, %v777_v62  ;;  %1153 = vmatmul.f32.gmra.mxu2 %v1085_v47  ;;  %v787_v0 = vor.u32 1.1754944e-38, %v786_v55  ;;  %vm785_vm3 = vcmp.eq.f32.partialorder %v784_v44, 8.507059e+37  ;;  %v799_v19 = vand.u32 2147483647, %v2211_v52 }
 0x15a   : > { %v1412_v63 = vmul.f32 -1.442695, %v2213_v46  ;;  %v948_v3 = vsel %vm2207_vm15, %v1568_v5, %v944_v30  ;;  %v974_v7 = vmul.f32 %v958_v6, %v2140_v34  ;;  %v1097_v10 = vmul.f32 %v1076_v1, %v985_v53  ;;  %v621_v38 = vpop.f32.mrf.mxu1 }
 0x15b   : > { %v1574_v20 = vpop.eup %1573  ;;  %v953_v8 = vsel %vm2197_vm14, %v952_v50, %v948_v3  ;;  %v779_v15 = vadd.f32 %v1570_v36, %v778_v4  ;;  %v801_v31 = vand.u32 2147483648, %v2211_v52  ;;  %vm795_vm5 = vweird.f32 %v2211_v52 }
 0x15c   : > { %1577 = vpow2.f32 %v1412_v63  ;;  %v970_v9 = vmul.f32 %v953_v8, %v2078_v42  ;;  %v705_v16 = vadd.f32 1.0, %v1574_v20  ;;  %v1086_v34 = vmul.f32 %v2068_v37, %v974_v7 }
 0x15d   : > { %v783_v18 = vsel %vm782_vm2, %v1570_v36, %v779_v15  ;;  %vm800_vm7 = vcmp.eq.f32.partialorder %v799_v19, 8.507059e+37 }
 0x15e   : > { %1579 = vrcp.f32 %v705_v16  ;;  %v1576_v59 = vpop.eup %1575  ;;  %v788_v58 = vsel %vm785_vm3, %v787_v0, %v783_v18  ;;  %1189 = vmatmul.f32.gmra.mxu3 %v1097_v10  ;;  %v814_v45 = vand.u32 2147483647, %v705_v16  ;;  %v816_v54 = vand.u32 2147483648, %v705_v16 }
 0x15f   : > { %v648_v5 = vpop.f32.mrf.mxu3  ;;  %v959_v25 = vmul.f32 %v788_v58, %v2094_v56  ;;  %v791_v60 = vmul.f32 %v1576_v59, %v2211_v52  ;;  %vm796_vm4 = vweird.f32 %v1576_v59  ;;  %vm810_vm9 = vweird.f32 %v705_v16 }
 0x160   : > { %v986_v21 = vmul.f32 %v970_v9, %v648_v5  ;;  %vm797_vm6 = vmor %vm795_vm5, %vm796_vm4  ;;  %vm815_vm11 = vcmp.eq.f32.partialorder %v814_v45, 8.507059e+37  ;;  %v817_v62 = vor.u32 1.1754944e-38, %v816_v54 }
 0x161   : > { %v2233_v51 = vpop.f32.mrf.mxu0  ;;  %v792_v29 = vsub.f32 1.0, %v791_v60  ;;  %1156 = vmatmul.f32.gmra.mxu2 %v1086_v34  ;;  %v975_v37 = vmul.f32 %v959_v25, %v2187_v23  ;;  %v802_v23 = vor.u32 1.1754944e-38, %v801_v31 }
 0x162   : > { %v1578_v42 = vpop.eup %1577  ;;  %v1413_v22 = vmul.f32 -1.442695, %v2233_v51  ;;  %v1098_v32 = vmul.f32 %v1081_v27, %v986_v21  ;;  %v624_v10 = vpop.f32.mrf.mxu1 }
 0x163   : > { %v2237_v26 = vadd.f32 1.0, %v1578_v42  ;;  %v793_v56 = vmul.f32 %v1576_v59, %v792_v29  ;;  %v1087_v12 = vmul.f32 %v2040_v11, %v975_v37 }
 0x164   : > { %v1580_v35 = vpop.eup %1579 }
 0x165   : > { %1581 = vrcp.f32 %v2237_v26  ;;  %v806_v36 = vmul.f32 %v1580_v35, %v705_v16  ;;  %v794_v43 = vadd.f32 %v1576_v59, %v793_v56  ;;  %vm811_vm8 = vweird.f32 %v1580_v35 }
 0x166   : > { %1583 = vpow2.f32 %v1413_v22  ;;  %1192 = vmatmul.f32.gmra.mxu3 %v1098_v32  ;;  %vm812_vm10 = vmor %vm810_vm9, %vm811_vm8  ;;  %v829_v3 = vand.u32 2147483647, %v2237_v26  ;;  %v831_v4 = vand.u32 2147483648, %v2237_v26  ;;  %vm825_vm13 = vweird.f32 %v2237_v26 }
 0x167   : > { %v807_v61 = vsub.f32 1.0, %v806_v36  ;;  %v798_v41 = vsel %vm797_vm6, %v1576_v59, %v794_v43 }
 0x168   : > { %v803_v24 = vsel %vm800_vm7, %v802_v23, %v798_v41  ;;  %v832_v16 = vor.u32 1.1754944e-38, %v831_v4  ;;  %vm830_vm15 = vcmp.eq.f32.partialorder %v829_v3, 8.507059e+37 }
 0x169   : > { %v2246_v40 = vpop.f32.mrf.mxu0  ;;  %v808_v50 = vmul.f32 %v1580_v35, %v807_v61  ;;  %v960_v52 = vmul.f32 %v803_v24, %v2138_v33  ;;  %1159 = vmatmul.f32.gmra.mxu2 %v1087_v12 }
 0x16a   : > { %v1414_v47 = vmul.f32 -1.442695, %v2246_v40  ;;  %v627_v19 = vpop.f32.mrf.mxu1 }
 0x16b   : > { %v1582_v48 = vpop.eup %1581  ;;  %v809_v6 = vadd.f32 %v1580_v35, %v808_v50  ;;  %v976_v44 = vmul.f32 %v960_v52, %v2227_v13 }
 0x16c   : > { %v1584_v53 = vpop.eup %1583  ;;  %v821_v11 = vmul.f32 %v1582_v48, %v2237_v26  ;;  %1585 = vpow2.f32 %v1414_v47  ;;  %vm826_vm12 = vweird.f32 %v1582_v48 }
 0x16d   : > { %v707_v30 = vadd.f32 1.0, %v1584_v53  ;;  %v813_v55 = vsel %vm812_vm10, %v1580_v35, %v809_v6  ;;  %v1088_v7 = vmul.f32 %v2084_v49, %v976_v44  ;;  %vm827_vm14 = vmor %vm825_vm13, %vm826_vm12 }
 0x16e   : > { %v822_v63 = vsub.f32 1.0, %v821_v11  ;;  %v818_v33 = vsel %vm815_vm11, %v817_v62, %v813_v55 }
 0x16f   : > { %1587 = vrcp.f32 %v707_v30  ;;  %v961_v20 = vmul.f32 %v818_v33, %v2174_v14  ;;  %v846_v42 = vand.u32 2147483648, %v707_v30  ;;  %v844_v22 = vand.u32 2147483647, %v707_v30 }
 0x170   : > { %v823_v1 = vmul.f32 %v1582_v48, %v822_v63  ;;  %vm840_vm1 = vweird.f32 %v707_v30 }
 0x171   : > { %v2256_v8 = vpop.f32.mrf.mxu0  ;;  %1162 = vmatmul.f32.gmra.mxu2 %v1088_v7  ;;  %v977_v18 = vmul.f32 %v961_v20, %v621_v38  ;;  %vm845_vm3 = vcmp.eq.f32.partialorder %v844_v22, 8.507059e+37 }
 0x172   : > { %v1586_v9 = vpop.eup %1585  ;;  %v824_v15 = vadd.f32 %v1582_v48, %v823_v1  ;;  %v1415_v13 = vmul.f32 -1.442695, %v2256_v8  ;;  %v630_v11 = vpop.f32.mrf.mxu1 }
 0x173   : > { %v708_v0 = vadd.f32 1.0, %v1586_v9  ;;  %v1089_v21 = vmul.f32 %v2105_v2, %v977_v18  ;;  %v847_v2 = vor.u32 1.1754944e-38, %v846_v42 }
 0x174   : > { %v828_v5 = vsel %vm827_vm14, %v1582_v48, %v824_v15  ;;  %1589 = vpow2.f32 %v1415_v13 }
 0x175   : > { %v1588_v49 = vpop.eup %1587  ;;  %v833_v34 = vsel %vm830_vm15, %v832_v16, %v828_v5  ;;  %1591 = vrcp.f32 %v708_v0  ;;  %v859_v38 = vand.u32 2147483647, %v708_v0  ;;  %v861_v43 = vand.u32 2147483648, %v708_v0 }
 0x176   : > { %v836_v14 = vmul.f32 %v1588_v49, %v707_v30  ;;  %v962_v59 = vmul.f32 %v833_v34, %v2213_v46  ;;  %vm841_vm0 = vweird.f32 %v1588_v49  ;;  %vm855_vm5 = vweird.f32 %v708_v0 }
 0x177   : > { %vm842_vm2 = vmor %vm840_vm1, %vm841_vm0  ;;  %v862_v47 = vor.u32 1.1754944e-38, %v861_v43  ;;  %vm860_vm7 = vcmp.eq.f32.partialorder %v859_v38, 8.507059e+37 }
 0x178   : > { %v837_v58 = vsub.f32 1.0, %v836_v14  ;;  %v978_v46 = vmul.f32 %v962_v59, %v624_v10 }
 0x179   : > { %v2262_v25 = vpop.f32.mrf.mxu0  ;;  %1165 = vmatmul.f32.gmra.mxu2 %v1089_v21 }
 0x17a   : > { %v1590_v60 = vpop.eup %1589  ;;  %v838_v26 = vmul.f32 %v1588_v49, %v837_v58  ;;  %v1416_v27 = vmul.f32 -1.442695, %v2262_v25  ;;  %v1090_v61 = vmul.f32 %v2133_v28, %v978_v46  ;;  %v633_v15 = vpop.f32.mrf.mxu1 }
 0x17b   : > { %v1592_v29 = vpop.eup %1591  ;;  %v709_v37 = vadd.f32 1.0, %v1590_v60  ;;  %v1061_v58 = vpop.permute.xlu2 %1060 }
 0x17c   : > { %v839_v31 = vadd.f32 %v1588_v49, %v838_v26  ;;  %v851_v32 = vmul.f32 %v1592_v29, %v708_v0  ;;  %1593 = vpow2.f32 %v1416_v27  ;;  %vm856_vm4 = vweird.f32 %v1592_v29  ;;  %v1111_v26 = vld [vmem:[#allocation2 + $0x60] sm:$0xff] }
 0x17d   : > { %1595 = vrcp.f32 %v709_v37  ;;  %vm857_vm6 = vmor %vm855_vm5, %vm856_vm4  ;;  %v874_v6 = vand.u32 2147483647, %v709_v37  ;;  %v876_v30 = vand.u32 2147483648, %v709_v37  ;;  %vm870_vm9 = vweird.f32 %v709_v37  ;;  %v1100_v27 = vld [vmem:[#allocation2] sm:$0xff] }
 0x17e   : > { %v843_v35 = vsel %vm842_vm2, %v1588_v49, %v839_v31  ;;  %v852_v56 = vsub.f32 1.0, %v851_v32  ;;  %v1101_v31 = vld [vmem:[#allocation2 + $0x58] sm:$0xff] }
 0x17f   : > { %v848_v36 = vsel %vm845_vm3, %v847_v2, %v843_v35  ;;  %v877_v3 = vor.u32 1.1754944e-38, %v876_v30  ;;  %vm875_vm11 = vcmp.eq.f32.partialorder %v874_v6, 8.507059e+37  ;;  %v1113_v35 = vld [vmem:[#allocation2 + $0x78] sm:$0xff] }
 0x180   : > { %v963_v12 = vmul.f32 %v848_v36, %v2233_v51  ;;  %v853_v23 = vmul.f32 %v1592_v29, %v852_v56  ;;  %v1102_v36 = vld [vmem:[#allocation2 + $0x18] sm:$0xff] }
 0x181   : > { %1168 = vmatmul.f32.gmra.mxu2 %v1090_v61 }
 0x182   : > { %v1594_v41 = vpop.eup %1593  ;;  %v854_v45 = vadd.f32 %v1592_v29, %v853_v23  ;;  %v979_v53 = vmul.f32 %v963_v12, %v627_v19  ;;  %v636_v59 = vpop.f32.mrf.mxu1  ;;  %v1114_v23 = vld [vmem:[#allocation2 + $0x28] sm:$0xff] }
 0x183   : > { %v1596_v54 = vpop.eup %1595  ;;  %v710_v48 = vadd.f32 1.0, %v1594_v41  ;;  %v1103_v41 = vld [vmem:[#allocation2 + $0x50] sm:$0xff] }
 0x184   : > { %v858_v24 = vsel %vm857_vm6, %v1592_v29, %v854_v45  ;;  %v866_v50 = vmul.f32 %v1596_v54, %v709_v37  ;;  %vm871_vm8 = vweird.f32 %v1596_v54  ;;  %v1091_v63 = vmul.f32 %v2147_v39, %v979_v53  ;;  %v1105_v53 = vld [vmem:[#allocation2 + $0x8] sm:$0xff] }
 0x185   : > { %v863_v52 = vsel %vm860_vm7, %v862_v47, %v858_v24  ;;  %1597 = vrcp.f32 %v710_v48  ;;  %vm872_vm10 = vmor %vm870_vm9, %vm871_vm8  ;;  %v889_v10 = vand.u32 2147483647, %v710_v48  ;;  %v891_v9 = vand.u32 2147483648, %v710_v48 }
 0x186   : > { %v867_v51 = vsub.f32 1.0, %v866_v50  ;;  %v964_v28 = vmul.f32 %v863_v52, %v2246_v40  ;;  %vm885_vm13 = vweird.f32 %v710_v48 }
 0x187   : > { %v892_v0 = vor.u32 1.1754944e-38, %v891_v9  ;;  %vm890_vm15 = vcmp.eq.f32.partialorder %v889_v10, 8.507059e+37 }
 0x188   : > { %v868_v62 = vmul.f32 %v1596_v54, %v867_v51  ;;  %v980_v1 = vmul.f32 %v964_v28, %v630_v11  ;;  %v1106_v51 = vld [vmem:[#allocation2 + $0x48] sm:$0xff]  ;;  %v1107_v28 = vld [vmem:[#allocation2 + $0x40] sm:$0xff] }
 0x189   : > { %1171 = vmatmul.f32.gmra.mxu2 %v1091_v63 }
 0x18a   : > { %v869_v44 = vadd.f32 %v1596_v54, %v868_v62  ;;  %v1092_v39 = vmul.f32 %v2178_v17, %v980_v1  ;;  %v1099_v17 = vld [vmem:[#allocation2 + $0x30] sm:$0xff] }
 0x18b   : > { %v1598_v55 = vpop.eup %1597 }
 0x18c   : > { %v873_v4 = vsel %vm872_vm10, %v1596_v54, %v869_v44  ;;  %v881_v33 = vmul.f32 %v1598_v55, %v710_v48  ;;  %vm886_vm12 = vweird.f32 %v1598_v55  ;;  %v1104_v48 = vld [vmem:[#allocation2 + $0x68] sm:$0xff]  ;;  %v1108_v44 = vld [vmem:[#allocation2 + $0x20] sm:$0xff] }
 0x18d   : > { %v878_v7 = vsel %vm875_vm11, %v877_v3, %v873_v4  ;;  %vm887_vm14 = vmor %vm885_vm13, %vm886_vm12  ;;  %v1109_v4 = vld [vmem:[#allocation2 + $0x10] sm:$0xff] }
 0x18e   : > { %v882_v20 = vsub.f32 1.0, %v881_v33  ;;  %v965_v40 = vmul.f32 %v878_v7, %v2256_v8  ;;  %v1110_v7 = vld [vmem:[#allocation2 + $0x38] sm:$0xff] }
 0x190   : > { %v883_v13 = vmul.f32 %v1598_v55, %v882_v20  ;;  %v981_v18 = vmul.f32 %v965_v40, %v633_v15 }
 0x191   : > { %1174 = vmatmul.f32.gmra.mxu2 %v1092_v39 }
 0x192   : > { %v884_v16 = vadd.f32 %v1598_v55, %v883_v13  ;;  %v1093_v14 = vmul.f32 %v2215_v57, %v981_v18 }
 0x194   : > { %v888_v5 = vsel %vm887_vm14, %v1598_v55, %v884_v16 }
 0x195   : > { %v893_v49 = vsel %vm890_vm15, %v892_v0, %v888_v5 }
 0x196   : > { %v966_v34 = vmul.f32 %v893_v49, %v2262_v25  ;;  %v1112_v25 = vld [vmem:[#allocation2 + $0x70] sm:$0xff] }
 0x198   : > { %v982_v8 = vmul.f32 %v966_v34, %v636_v59 }
 0x199   : > { %1177 = vmatmul.f32.gmra.mxu2 %v1093_v14 }
 0x19a   : > { %v1094_v21 = vmul.f32 %v1061_v58, %v982_v8 }
 0x1a1   : > { %1180 = vmatmul.f32.gmra.mxu2 %v1094_v21 }
 0x1cb   : > { %v1148_v42 = vpop.f32.mrf.mxu2 }
 0x1cc   : > { %v1196_v60 = vadd.f32 %v1148_v42, %v1099_v17 }
 0x1ce   : > { %1212 = vst [vmem:[#allocation2 + $0x30] sm:$0xff] %v1196_v60 }
 0x1d0   : > { %v1184_v22 = vpop.f32.mrf.mxu3 }
 0x1d1   : > { %v1208_v29 = vadd.f32 %v1184_v22, %v1111_v26 }
 0x1d3   : > { %1224 = vst [vmem:[#allocation2 + $0x60] sm:$0xff] %v1208_v29 }
 0x1d4   : > { %v1151_v37 = vpop.f32.mrf.mxu2 }
 0x1d5   : > { %v1197_v19 = vadd.f32 %v1151_v37, %v1100_v27 }
 0x1d7   : > { %1213 = vst [vmem:[#allocation2] sm:$0xff] %v1197_v19 }
 0x1d9   : > { %v1187_v57 = vpop.f32.mrf.mxu3 }
 0x1da   : > { %v1209_v32 = vadd.f32 %v1187_v57, %v1112_v25 }
 0x1dc   : > { %v1154_v46 = vpop.f32.mrf.mxu2  ;;  %1225 = vst [vmem:[#allocation2 + $0x70] sm:$0xff] %v1209_v32 }
 0x1dd   : > { %v1198_v2 = vadd.f32 %v1154_v46, %v1101_v31 }
 0x1df   : > { %1214 = vst [vmem:[#allocation2 + $0x58] sm:$0xff] %v1198_v2 }
 0x1e1   : > { %v1190_v56 = vpop.f32.mrf.mxu3 }
 0x1e2   : > { %v1210_v38 = vadd.f32 %v1190_v56, %v1113_v35 }
 0x1e4   : > { %v1157_v43 = vpop.f32.mrf.mxu2  ;;  %1226 = vst [vmem:[#allocation2 + $0x78] sm:$0xff] %v1210_v38 }
 0x1e5   : > { %v1199_v12 = vadd.f32 %v1157_v43, %v1102_v36 }
 0x1e7   : > { %1215 = vst [vmem:[#allocation2 + $0x18] sm:$0xff] %v1199_v12 }
 0x1e9   : > { %v1193_v61 = vpop.f32.mrf.mxu3 }
 0x1ea   : > { %v1211_v45 = vadd.f32 %v1193_v61, %v1114_v23 }
 0x1ec   : > { %v1160_v54 = vpop.f32.mrf.mxu2  ;;  %1227 = vst [vmem:[#allocation2 + $0x28] sm:$0xff] %v1211_v45 }
 0x1ed   : > { %v1200_v47 = vadd.f32 %v1160_v54, %v1103_v41 }
 0x1ef   : > { %1216 = vst [vmem:[#allocation2 + $0x50] sm:$0xff] %v1200_v47 }
 0x1f4   : > { %v1163_v24 = vpop.f32.mrf.mxu2 }
 0x1f5   : > { %v1201_v50 = vadd.f32 %v1163_v24, %v1104_v48 }
 0x1f7   : > { %1217 = vst [vmem:[#allocation2 + $0x68] sm:$0xff] %v1201_v50 }
 0x1fc   : > { %v1166_v52 = vpop.f32.mrf.mxu2 }
 0x1fd   : > { %v1202_v11 = vadd.f32 %v1166_v52, %v1105_v53 }
 0x1ff   : > { %1218 = vst [vmem:[#allocation2 + $0x8] sm:$0xff] %v1202_v11 }
 0x204   : > { %v1169_v6 = vpop.f32.mrf.mxu2 }
 0x205   : > { %v1203_v30 = vadd.f32 %v1169_v6, %v1106_v51 }
 0x207   : > { %1219 = vst [vmem:[#allocation2 + $0x48] sm:$0xff] %v1203_v30 }
 0x20c   : > { %v1172_v62 = vpop.f32.mrf.mxu2 }
 0x20d   : > { %v1204_v63 = vadd.f32 %v1172_v62, %v1107_v28 }
 0x20f   : > { %1220 = vst [vmem:[#allocation2 + $0x40] sm:$0xff] %v1204_v63 }
 0x214   : > { %v1175_v55 = vpop.f32.mrf.mxu2 }
 0x215   : > { %v1205_v3 = vadd.f32 %v1175_v55, %v1108_v44 }
 0x217   : > { %1221 = vst [vmem:[#allocation2 + $0x20] sm:$0xff] %v1205_v3 }
 0x21c   : > { %v1178_v33 = vpop.f32.mrf.mxu2 }
 0x21d   : > { %v1206_v1 = vadd.f32 %v1178_v33, %v1109_v4 }
 0x21f   : > { %1222 = vst [vmem:[#allocation2 + $0x10] sm:$0xff] %v1206_v1 }
 0x224   : > { %v1181_v20 = vpop.f32.mrf.mxu2 }
 0x225   : > { %v1207_v10 = vadd.f32 %v1181_v20, %v1110_v7 }
 0x227   : > { %1223 = vst [vmem:[#allocation2 + $0x38] sm:$0xff] %v1207_v10 }
 0x228 PF: > { %p1421_p1 = scmp.ne.s32.totalorder %s1663_s7, 1 }
 0x22a   : > { %1231 = sbr.rel (%p1421_p1) target bundleno = 576 (0x240), region = 71 }
 0x22f   : > { %v1232_v9 = vld [vmem:[#allocation2 + $0x30] sm:$0xff]  ;;  %v1233_v15 = vld [vmem:[#allocation2] sm:$0xff]  ;;  %v1234_v40 = vld [vmem:[#allocation2 + $0x58] sm:$0xff] }
 0x230   : > { %1248 = vst [vmem:[%s1882_s29] sm:$0xff] %v1232_v9  ;;  %v1235_v13 = vld [vmem:[#allocation2 + $0x18] sm:$0xff]  ;;  %v1236_v39 = vld [vmem:[#allocation2 + $0x50] sm:$0xff]  ;;  %v1237_v16 = vld [vmem:[#allocation2 + $0x68] sm:$0xff] }
 0x231   : > { %1249 = vst [vmem:[%s1882_s29 + $0x8] sm:$0xff] %v1233_v15  ;;  %v1238_v0 = vld [vmem:[#allocation2 + $0x8] sm:$0xff]  ;;  %v1240_v18 = vld [vmem:[#allocation2 + $0x40] sm:$0xff]  ;;  %v1242_v34 = vld [vmem:[#allocation2 + $0x10] sm:$0xff] }
 0x232   : > { %1250 = vst [vmem:[%s1882_s29 + $0x10] sm:$0xff] %v1234_v40  ;;  %v1239_v5 = vld [vmem:[#allocation2 + $0x48] sm:$0xff]  ;;  %v1241_v49 = vld [vmem:[#allocation2 + $0x20] sm:$0xff]  ;;  %v1243_v14 = vld [vmem:[#allocation2 + $0x38] sm:$0xff] }
 0x233   : > { %1251 = vst [vmem:[%s1882_s29 + $0x18] sm:$0xff] %v1235_v13  ;;  %v1244_v59 = vld [vmem:[#allocation2 + $0x60] sm:$0xff]  ;;  %v1245_v8 = vld [vmem:[#allocation2 + $0x70] sm:$0xff]  ;;  %v1246_v58 = vld [vmem:[#allocation2 + $0x78] sm:$0xff] }
 0x234   : > { %1252 = vst [vmem:[%s1882_s29 + $0x20] sm:$0xff] %v1236_v39  ;;  %v1247_v21 = vld [vmem:[#allocation2 + $0x28] sm:$0xff] }
 0x235   : > { %1253 = vst [vmem:[%s1882_s29 + $0x28] sm:$0xff] %v1237_v16 }
 0x236   : > { %1254 = vst [vmem:[%s1882_s29 + $0x30] sm:$0xff] %v1238_v0 }
 0x237   : > { %1255 = vst [vmem:[%s1882_s29 + $0x38] sm:$0xff] %v1239_v5 }
 0x238   : > { %1256 = vst [vmem:[%s1882_s29 + $0x40] sm:$0xff] %v1240_v18 }
 0x239   : > { %1257 = vst [vmem:[%s1882_s29 + $0x48] sm:$0xff] %v1241_v49 }
 0x23a   : > { %1258 = vst [vmem:[%s1882_s29 + $0x50] sm:$0xff] %v1242_v34 }
 0x23b   : > { %1259 = vst [vmem:[%s1882_s29 + $0x58] sm:$0xff] %v1243_v14 }
 0x23c   : > { %1260 = vst [vmem:[%s1882_s29 + $0x60] sm:$0xff] %v1244_v59 }
 0x23d   : > { %1261 = vst [vmem:[%s1882_s29 + $0x68] sm:$0xff] %v1245_v8 }
 0x23e   : > { %1262 = vst [vmem:[%s1882_s29 + $0x70] sm:$0xff] %v1246_v58 }
 0x23f   : > { %1263 = vst [vmem:[%s1882_s29 + $0x78] sm:$0xff] %v1247_v21 }
 0x240 PF: > { %s29_s9 = sadd.s32 1, %s1679_s9   ;;  %s2345_s29 = smov %s1659_s30 }
 0x241   : > { %p26_p2 = scmp.ge.s32.totalorder %s29_s9, 14   ;;  %s2346_s30 = smov %s1783_s27 }
 0x242   : > { %s2347_s7 = smov %s1671_s8  ;;  %s2348_s0 = smov %s1675_s1 }
 0x243   : > { %s2349_s8 = smov %s2354_s10  ;;  %s2350_s1 = smov %s2356_s11 }
 0x244   :  { %28 = sbr.rel (!%p26_p2) target bundleno = 13 (0xd), region = 115 }

</bundles_post_ra>
